<compile_context>
chip_gen: v7x
topology: tpu7x:2x2x1
jax: 0.10.0
libtpu: 0.0.40
codegen_flags: <defaults>
</compile_context>

<pallas_src>
import functools

import numpy as np
import jax
import jax.numpy as jnp
from jax.experimental import pallas as pl
from jax.experimental.pallas import tpu as pltpu


def _round_up(x, m):
    return (x + m - 1) // m * m


# ----------------------------------------------------------------------------
# Fused whole-tree kernel.  Grid: (num_levels,), deepest level first.
# ----------------------------------------------------------------------------
def _tree_lstm_kernel(
    # scalar prefetch (SMEM)
    child_tbl_ref,   # (num_levels, Lmax*Kmax) int32  child state-slot per (node, k); 0 = zero child
    out_tbl_ref,     # (num_levels, Lmax)      int32  destination state-slot per node slot
    # inputs (VMEM)
    x_ref,           # (1, Lmax, Dp)       per-level input rows (zero rows for padded slots)
    w_big_ref,       # (Dp + Mp, 4*Mp)     [[W_ioux | W_fx], [W_iouh | 0]]
    b_big_ref,       # (1, 4*Mp)           [b_ioux+b_iouh (i,o,u) | b_fx+b_fh]
    w_fh_ref,        # (Mp, Mp)
    # outputs (VMEM)
    c_out_ref,       # (num_slots, Mp)
    h_out_ref,       # (num_slots, Mp)
    # scratch (persist across grid steps)
    c_state,         # (num_slots, Mp)  per-node c
    h_state,         # (num_slots, Mp)  per-node h
    ch_stage,        # (Kmax*Lmax, Mp)  gathered children c  (plays "child_h" per the swap)
    cc_stage,        # (Kmax*Lmax, Mp)  gathered children h  (plays "child_c" per the swap)
    *,
    lmax, kmax, mp,
):
    lvl = pl.program_id(0)

    # Slot 0 is the all-zero sentinel used for missing / padded children.
    @pl.when(lvl == 0)
    def _init():
        c_state[...] = jnp.zeros_like(c_state)
        h_state[...] = jnp.zeros_like(h_state)

    # ---- gather children state for every node slot of this level ------------
    # NOTE: reproduces the reference swap:
    #   "child_h" role (h_sum + fh input) <- children's c
    #   "child_c" role (f * child_c)      <- children's h
    for l in range(lmax):
        for k in range(kmax):
            idx = child_tbl_ref[lvl, l * kmax + k]
            row = k * lmax + l
            ch_stage[row:row + 1, :] = c_state[pl.ds(idx, 1), :]
            cc_stage[row:row + 1, :] = h_state[pl.ds(idx, 1), :]

    x = x_ref[0]                               # (Lmax, Dp)
    ch_all = ch_stage[...]                     # (Kmax*Lmax, Mp)
    cc_all = cc_stage[...]                     # (Kmax*Lmax, Mp)

    h_sum = ch_all[0:lmax]
    for k in range(1, kmax):
        h_sum = h_sum + ch_all[k * lmax:(k + 1) * lmax]          # (Lmax, Mp)

    # ---- fused projection: [x | child_h_sum] @ W_big + b_big ----------------
    z = jnp.concatenate([x, h_sum], axis=1)                      # (Lmax, Dp+Mp)
    proj = (jnp.dot(z, w_big_ref[...], preferred_element_type=jnp.float32)
            + b_big_ref[...])                                    # (Lmax, 4*Mp)
    i = jax.nn.sigmoid(proj[:, 0 * mp:1 * mp])
    o = jax.nn.sigmoid(proj[:, 1 * mp:2 * mp])
    u = jnp.tanh(proj[:, 2 * mp:3 * mp])
    fx = proj[:, 3 * mp:4 * mp]                                  # (b_fx + b_fh already folded in)

    # ---- forget path: one batched matmul per child position -----------------
    w_fh = w_fh_ref[...]
    fc_sum = None
    for k in range(kmax):
        ch_k = ch_all[k * lmax:(k + 1) * lmax]
        cc_k = cc_all[k * lmax:(k + 1) * lmax]
        f_k = jax.nn.sigmoid(
            jnp.dot(ch_k, w_fh, preferred_element_type=jnp.float32) + fx)
        term = f_k * cc_k                                        # zero for sentinel children
        fc_sum = term if fc_sum is None else fc_sum + term

    c = i * u + fc_sum                                           # (Lmax, Mp)
    h = o * jnp.tanh(c)

    # ---- scatter results into the state table (padded slots -> dump slot) ---
    for l in range(lmax):
        dst = out_tbl_ref[lvl, l]
        c_state[pl.ds(dst, 1), :] = c[l:l + 1, :]
        h_state[pl.ds(dst, 1), :] = h[l:l + 1, :]

    @pl.when(lvl == pl.num_programs(0) - 1)
    def _finalize():
        c_out_ref[...] = c_state[...]
        h_out_ref[...] = h_state[...]


def _build_tree_lstm_call(num_levels, lmax, kmax, num_slots, dp, mp):
    kernel = functools.partial(_tree_lstm_kernel, lmax=lmax, kmax=kmax, mp=mp)
    grid_spec = pltpu.PrefetchScalarGridSpec(
        num_scalar_prefetch=2,
        grid=(num_levels,),
        in_specs=[
            pl.BlockSpec((1, lmax, dp), lambda lvl, *_: (lvl, 0, 0)),      # x per level
            pl.BlockSpec((dp + mp, 4 * mp), lambda lvl, *_: (0, 0)),       # W_big (resident)
            pl.BlockSpec((1, 4 * mp), lambda lvl, *_: (0, 0)),             # b_big (resident)
            pl.BlockSpec((mp, mp), lambda lvl, *_: (0, 0)),                # W_fh  (resident)
        ],
        out_specs=(
            pl.BlockSpec((num_slots, mp), lambda lvl, *_: (0, 0)),
            pl.BlockSpec((num_slots, mp), lambda lvl, *_: (0, 0)),
        ),
        scratch_shapes=[
            pltpu.VMEM((num_slots, mp), jnp.float32),       # c state table
            pltpu.VMEM((num_slots, mp), jnp.float32),       # h state table
            pltpu.VMEM((kmax * lmax, mp), jnp.float32),     # gathered children c
            pltpu.VMEM((kmax * lmax, mp), jnp.float32),     # gathered children h
        ],
    )
    return pl.pallas_call(
        kernel,
        grid_spec=grid_spec,
        out_shape=(
            jax.ShapeDtypeStruct((num_slots, mp), jnp.float32),
            jax.ShapeDtypeStruct((num_slots, mp), jnp.float32),
        ),
        compiler_params=pltpu.CompilerParams(
            dimension_semantics=("arbitrary",),   # levels are sequentially dependent
        ),
    )


# ----------------------------------------------------------------------------
# Parameters (deterministic init; weights pre-transposed to (fan_in, fan_out)).
# ----------------------------------------------------------------------------
def linear_params(key, fan_in, fan_out):
    kw, kb = jax.random.split(key)
    bound = 1.0 / float(fan_in) ** 0.5
    w = jax.random.uniform(kw, (fan_in, fan_out), jnp.float32, -bound, bound)
    b = jax.random.uniform(kb, (1, fan_out), jnp.float32, -bound, bound)
    return w, b


def init_params(key, in_dim, mem_dim):
    keys = jax.random.split(key, 4)
    return {
        "ioux": linear_params(keys[0], in_dim, 3 * mem_dim),
        "iouh": linear_params(keys[1], mem_dim, 3 * mem_dim),
        "fx":   linear_params(keys[2], in_dim, mem_dim),
        "fh":   linear_params(keys[3], mem_dim, mem_dim),
        # W, U, small_w, Wa are declared in __init__ but unused in forward().
    }


def pack_params(params, in_dim, mem_dim, dp, mp):
    """Build the lane-padded fused weights used by the kernel."""
    w_ioux, b_ioux = params["ioux"]
    w_iouh, b_iouh = params["iouh"]
    w_fx, b_fx = params["fx"]
    w_fh, b_fh = params["fh"]
    M = mem_dim
    w_big = jnp.zeros((dp + mp, 4 * mp), jnp.float32)
    b_big = jnp.zeros((1, 4 * mp), jnp.float32)
    for g in range(3):  # i, o, u slabs, each 128-lane aligned
        w_big = w_big.at[:in_dim, g * mp:g * mp + M].set(w_ioux[:, g * M:(g + 1) * M])
        w_big = w_big.at[dp:dp + M, g * mp:g * mp + M].set(w_iouh[:, g * M:(g + 1) * M])
        b_big = b_big.at[:, g * mp:g * mp + M].set(
            b_ioux[:, g * M:(g + 1) * M] + b_iouh[:, g * M:(g + 1) * M])
    w_big = w_big.at[:in_dim, 3 * mp:3 * mp + M].set(w_fx)
    b_big = b_big.at[:, 3 * mp:3 * mp + M].set(b_fx + b_fh)   # fold both forget biases
    w_fh_p = jnp.zeros((mp, mp), jnp.float32).at[:M, :M].set(w_fh)
    return w_big, b_big, w_fh_p


# ----------------------------------------------------------------------------
# Host-side tree & level schedule (pure structure; built once per tree shape).
# ----------------------------------------------------------------------------
class Tree:
    def __init__(self, idx, children=None):
        self.idx = idx
        self.children = list(children) if children else []
        self.num_children = len(self.children)


def build_schedule(root, num_nodes):
    levels = {}
    queue = [(root, 0)]
    kmax = 1
    while queue:
        node, depth = queue.pop(0)
        levels.setdefault(depth, []).append(node)
        kmax = max(kmax, node.num_children)
        for ch in node.children:
            queue.append((ch, depth + 1))
    max_depth = max(levels)
    num_levels = max_depth + 1
    lmax = _round_up(max(len(v) for v in levels.values()), 8)

    dump_slot = num_nodes + 1                  # scratch slot for padded node positions
    num_slots = _round_up(num_nodes + 2, 8)    # 0: zero sentinel, 1..N: nodes, N+1: dump

    child_tbl = np.zeros((num_levels, lmax * kmax), np.int32)    # 0 => zero child
    out_tbl = np.full((num_levels, lmax), dump_slot, np.int32)
    node_tbl = np.full((num_levels, lmax), num_nodes, np.int32)  # num_nodes => zero x row

    for g in range(num_levels):
        depth = max_depth - g                  # deepest level first
        for l, node in enumerate(levels[depth]):
            out_tbl[g, l] = node.idx + 1
            node_tbl[g, l] = node.idx
            for k, ch in enumerate(node.children):
                child_tbl[g, l * kmax + k] = ch.idx + 1
    return child_tbl, out_tbl, node_tbl, num_levels, lmax, kmax, num_slots


@functools.partial(
    jax.jit,
    static_argnames=("in_dim", "mem_dim", "num_levels", "lmax", "kmax", "num_slots"),
)
def tree_lstm_device(inputs, params, child_tbl, out_tbl, node_tbl, root_slot, *,
                     in_dim, mem_dim, num_levels, lmax, kmax, num_slots):
    dp = _round_up(in_dim, 128)
    mp = _round_up(mem_dim, 128)
    w_big, b_big, w_fh_p = pack_params(params, in_dim, mem_dim, dp, mp)

    # Per-level, per-slot input rows (zero rows for padded slots), lane-padded.
    x_flat = inputs.reshape(-1, in_dim)
    x_flat = jnp.concatenate([x_flat, jnp.zeros((1, in_dim), jnp.float32)], axis=0)
    x_sched = jnp.pad(x_flat[node_tbl], ((0, 0), (0, 0), (0, dp - in_dim)))

    call = _build_tree_lstm_call(num_levels, lmax, kmax, num_slots, dp, mp)
    c_state, h_state = call(child_tbl, out_tbl, x_sched, w_big, b_big, w_fh_p)
    root_c = c_state[root_slot, :mem_dim][None, :]
    root_h = h_state[root_slot, :mem_dim][None, :]
    return root_h, root_c


# ----------------------------------------------------------------------------
# Pure-JAX reference (mirrors the PyTorch forward node-by-node, incl. the swap).
# ----------------------------------------------------------------------------
def reference_forward(root, inputs, params, mem_dim):
    hi = jax.lax.Precision.HIGHEST
    w_ioux, b_ioux = params["ioux"]
    w_iouh, b_iouh = params["iouh"]
    w_fx, b_fx = params["fx"]
    w_fh, b_fh = params["fh"]
    M = mem_dim

    def node_forward(x, child_c, child_h):
        child_h_sum = jnp.sum(child_h, axis=0, keepdims=True)
        iou = (jnp.dot(x, w_ioux, precision=hi) + b_ioux
               + jnp.dot(child_h_sum, w_iouh, precision=hi) + b_iouh)
        i = jax.nn.sigmoid(iou[:, :M])
        o = jax.nn.sigmoid(iou[:, M:2 * M])
        u = jnp.tanh(iou[:, 2 * M:])
        f = jax.nn.sigmoid(jnp.dot(child_h, w_fh, precision=hi) + b_fh
                           + jnp.dot(x, w_fx, precision=hi) + b_fx)
        c = i * u + jnp.sum(f * child_c, axis=0, keepdims=True)
        h = o * jnp.tanh(c)
        return c, h

    node_list = [root]
    start, end = 0, 1
    while start != end:
        for i in range(start, end):
            node_list += node_list[i].children
        start, end = end, len(node_list)
    hc = {}
    for node in node_list[::-1]:
        if node.num_children == 0:
            child_c = jnp.zeros((1, M), jnp.float32)
            child_h = jnp.zeros((1, M), jnp.float32)
        else:
            # reference swap: child_c <- cat(h), child_h <- cat(c)
            child_c = jnp.concatenate([hc[ch.idx][1] for ch in node.children], axis=0)
            child_h = jnp.concatenate([hc[ch.idx][0] for ch in node.children], axis=0)
        c, h = node_forward(inputs[node.idx], child_c, child_h)
        hc[node.idx] = (c, h)
    return hc[root.idx][1], hc[root.idx][0]   # (root_h, root_c)


# ----------------------------------------------------------------------------
if __name__ == "__main__":
    in_dim = 32
    mem_param = 16                 # module arg `mem_dim`
    mem_dim = 2 * mem_param        # internal self.mem_dim

    # Small tree: 0 -> {1, 2}; 1 -> {3, 4}; 2 -> {5, 6}
    n3, n4, n5, n6 = Tree(3), Tree(4), Tree(5), Tree(6)
    n1, n2 = Tree(1, [n3, n4]), Tree(2, [n5, n6])
    root = Tree(0, [n1, n2])
    num_nodes = 7

    key = jax.random.PRNGKey(0)
    k_in, k_par = jax.random.split(key)
    inputs = jax.random.normal(k_in, (num_nodes, 1, in_dim), jnp.float32)
    params = init_params(k_par, in_dim, mem_dim)

    (child_tbl, out_tbl, node_tbl,
     num_levels, lmax, kmax, num_slots) = build_schedule(root, num_nodes)

    root_h, root_c = tree_lstm_device(
        inputs, params,
        jnp.asarray(child_tbl), jnp.asarray(out_tbl), jnp.asarray(node_tbl),
        root.idx + 1,
        in_dim=in_dim, mem_dim=mem_dim, num_levels=num_levels,
        lmax=lmax, kmax=kmax, num_slots=num_slots)
    jax.block_until_ready((root_h, root_c))

    ref_h, ref_c = reference_forward(root, inputs, params, mem_dim)
    assert root_h.shape == (1, mem_dim) and root_c.shape == (1, mem_dim)
    assert jnp.allclose(root_h, ref_h, atol=1e-3, rtol=1e-3), "root_h mismatch"
    assert jnp.allclose(root_c, ref_c, atol=1e-3, rtol=1e-3), "root_c mismatch"
    print("KERNEL_OK")
</pallas_src>

<mosaic_0001>
module attributes {stable_mosaic.version = 11 : i64} {
  func.func @_tree_lstm_kernel(%arg0: i32, %arg1: memref<3x16xi32, #tpu.memory_space<smem>>, %arg2: memref<3x8xi32, #tpu.memory_space<smem>>, %arg3: memref<1x8x128xf32, #tpu.memory_space<vmem>>, %arg4: memref<256x512xf32, #tpu.memory_space<vmem>>, %arg5: memref<1x512xf32, #tpu.memory_space<vmem>>, %arg6: memref<128x128xf32, #tpu.memory_space<vmem>>, %arg7: memref<16x128xf32, #tpu.memory_space<vmem>>, %arg8: memref<16x128xf32, #tpu.memory_space<vmem>>, %arg9: memref<16x128xf32, #tpu.memory_space<vmem>>, %arg10: memref<16x128xf32, #tpu.memory_space<vmem>>, %arg11: memref<16x128xf32, #tpu.memory_space<vmem>>, %arg12: memref<16x128xf32, #tpu.memory_space<vmem>>) attributes {dimension_semantics = [#tpu.dimension_semantics<arbitrary>], iteration_bounds = array<i64: 3>, scalar_prefetch = 2 : i64, scratch_operands = 4 : i64, tpu.core_type = #tpu.core_type<tc>, window_params = [{transform_indices = @transform_0, window_bounds = array<i64: 1, 8, 128>}, {pipeline_mode = #tpu.pipeline_mode<synchronous>, transform_indices = @transform_1, window_bounds = array<i64: 256, 512>}, {pipeline_mode = #tpu.pipeline_mode<synchronous>, transform_indices = @transform_2, window_bounds = array<i64: 1, 512>}, {pipeline_mode = #tpu.pipeline_mode<synchronous>, transform_indices = @transform_3, window_bounds = array<i64: 128, 128>}, {pipeline_mode = #tpu.pipeline_mode<synchronous>, transform_indices = @transform_4, window_bounds = array<i64: 16, 128>}, {pipeline_mode = #tpu.pipeline_mode<synchronous>, transform_indices = @transform_5, window_bounds = array<i64: 16, 128>}]} {
    %c0_i32 = arith.constant 0 : i32
    %0 = arith.cmpi eq, %arg0, %c0_i32 : i32
    %1 = arith.extui %0 : i1 to i32
    %c0_i32_0 = arith.constant 0 : i32
    %2 = arith.cmpi ne, %1, %c0_i32_0 : i32
    scf.if %2 {
      %cst_141 = arith.constant 0.000000e+00 : f32
      %252 = vector.broadcast %cst_141 : f32 to vector<16x128xf32>
      %c0_142 = arith.constant 0 : index
      %c0_143 = arith.constant 0 : index
      %253 = vector.load %arg9[%c0_142, %c0_143] : memref<16x128xf32, #tpu.memory_space<vmem>>, vector<16x128xf32>
      tpu.vector_store %arg9[%c0_142, %c0_143], %252 {strides = array<i32>} : memref<16x128xf32, #tpu.memory_space<vmem>>, vector<16x128xf32>,
      %cst_144 = arith.constant 0.000000e+00 : f32
      %254 = vector.broadcast %cst_144 : f32 to vector<16x128xf32>
      %c0_145 = arith.constant 0 : index
      %c0_146 = arith.constant 0 : index
      %255 = vector.load %arg10[%c0_145, %c0_146] : memref<16x128xf32, #tpu.memory_space<vmem>>, vector<16x128xf32>
      tpu.vector_store %arg10[%c0_145, %c0_146], %254 {strides = array<i32>} : memref<16x128xf32, #tpu.memory_space<vmem>>, vector<16x128xf32>,
    } else {
    }
    %3 = arith.index_cast %arg0 : i32 to index
    %c0 = arith.constant 0 : index
    %4 = memref.load %arg1[%3, %c0] : memref<3x16xi32, #tpu.memory_space<smem>>
    %5 = arith.index_cast %4 : i32 to index
    %c0_1 = arith.constant 0 : index
    %6 = vector.load %arg9[%5, %c0_1] : memref<16x128xf32, #tpu.memory_space<vmem>>, vector<1x128xf32>
    %c0_2 = arith.constant 0 : index
    %c0_3 = arith.constant 0 : index
    %7 = vector.load %arg11[%c0_2, %c0_3] : memref<16x128xf32, #tpu.memory_space<vmem>>, vector<1x128xf32>
    tpu.vector_store %arg11[%c0_2, %c0_3], %6 {strides = array<i32>} : memref<16x128xf32, #tpu.memory_space<vmem>>, vector<1x128xf32>,
    %8 = arith.index_cast %4 : i32 to index
    %c0_4 = arith.constant 0 : index
    %9 = vector.load %arg10[%8, %c0_4] : memref<16x128xf32, #tpu.memory_space<vmem>>, vector<1x128xf32>
    %c0_5 = arith.constant 0 : index
    %c0_6 = arith.constant 0 : index
    %10 = vector.load %arg12[%c0_5, %c0_6] : memref<16x128xf32, #tpu.memory_space<vmem>>, vector<1x128xf32>
    tpu.vector_store %arg12[%c0_5, %c0_6], %9 {strides = array<i32>} : memref<16x128xf32, #tpu.memory_space<vmem>>, vector<1x128xf32>,
    %11 = arith.index_cast %arg0 : i32 to index
    %c1 = arith.constant 1 : index
    %12 = memref.load %arg1[%11, %c1] : memref<3x16xi32, #tpu.memory_space<smem>>
    %13 = arith.index_cast %12 : i32 to index
    %c0_7 = arith.constant 0 : index
    %14 = vector.load %arg9[%13, %c0_7] : memref<16x128xf32, #tpu.memory_space<vmem>>, vector<1x128xf32>
    %c8 = arith.constant 8 : index
    %c0_8 = arith.constant 0 : index
    %15 = vector.load %arg11[%c8, %c0_8] : memref<16x128xf32, #tpu.memory_space<vmem>>, vector<1x128xf32>
    tpu.vector_store %arg11[%c8, %c0_8], %14 {strides = array<i32>} : memref<16x128xf32, #tpu.memory_space<vmem>>, vector<1x128xf32>,
    %16 = arith.index_cast %12 : i32 to index
    %c0_9 = arith.constant 0 : index
    %17 = vector.load %arg10[%16, %c0_9] : memref<16x128xf32, #tpu.memory_space<vmem>>, vector<1x128xf32>
    %c8_10 = arith.constant 8 : index
    %c0_11 = arith.constant 0 : index
    %18 = vector.load %arg12[%c8_10, %c0_11] : memref<16x128xf32, #tpu.memory_space<vmem>>, vector<1x128xf32>
    tpu.vector_store %arg12[%c8_10, %c0_11], %17 {strides = array<i32>} : memref<16x128xf32, #tpu.memory_space<vmem>>, vector<1x128xf32>,
    %19 = arith.index_cast %arg0 : i32 to index
    %c2 = arith.constant 2 : index
    %20 = memref.load %arg1[%19, %c2] : memref<3x16xi32, #tpu.memory_space<smem>>
    %21 = arith.index_cast %20 : i32 to index
    %c0_12 = arith.constant 0 : index
    %22 = vector.load %arg9[%21, %c0_12] : memref<16x128xf32, #tpu.memory_space<vmem>>, vector<1x128xf32>
    %c1_13 = arith.constant 1 : index
    %c0_14 = arith.constant 0 : index
    %23 = vector.load %arg11[%c1_13, %c0_14] : memref<16x128xf32, #tpu.memory_space<vmem>>, vector<1x128xf32>
    tpu.vector_store %arg11[%c1_13, %c0_14], %22 {strides = array<i32>} : memref<16x128xf32, #tpu.memory_space<vmem>>, vector<1x128xf32>,
    %24 = arith.index_cast %20 : i32 to index
    %c0_15 = arith.constant 0 : index
    %25 = vector.load %arg10[%24, %c0_15] : memref<16x128xf32, #tpu.memory_space<vmem>>, vector<1x128xf32>
    %c1_16 = arith.constant 1 : index
    %c0_17 = arith.constant 0 : index
    %26 = vector.load %arg12[%c1_16, %c0_17] : memref<16x128xf32, #tpu.memory_space<vmem>>, vector<1x128xf32>
    tpu.vector_store %arg12[%c1_16, %c0_17], %25 {strides = array<i32>} : memref<16x128xf32, #tpu.memory_space<vmem>>, vector<1x128xf32>,
    %27 = arith.index_cast %arg0 : i32 to index
    %c3 = arith.constant 3 : index
    %28 = memref.load %arg1[%27, %c3] : memref<3x16xi32, #tpu.memory_space<smem>>
    %29 = arith.index_cast %28 : i32 to index
    %c0_18 = arith.constant 0 : index
    %30 = vector.load %arg9[%29, %c0_18] : memref<16x128xf32, #tpu.memory_space<vmem>>, vector<1x128xf32>
    %c9 = arith.constant 9 : index
    %c0_19 = arith.constant 0 : index
    %31 = vector.load %arg11[%c9, %c0_19] : memref<16x128xf32, #tpu.memory_space<vmem>>, vector<1x128xf32>
    tpu.vector_store %arg11[%c9, %c0_19], %30 {strides = array<i32>} : memref<16x128xf32, #tpu.memory_space<vmem>>, vector<1x128xf32>,
    %32 = arith.index_cast %28 : i32 to index
    %c0_20 = arith.constant 0 : index
    %33 = vector.load %arg10[%32, %c0_20] : memref<16x128xf32, #tpu.memory_space<vmem>>, vector<1x128xf32>
    %c9_21 = arith.constant 9 : index
    %c0_22 = arith.constant 0 : index
    %34 = vector.load %arg12[%c9_21, %c0_22] : memref<16x128xf32, #tpu.memory_space<vmem>>, vector<1x128xf32>
    tpu.vector_store %arg12[%c9_21, %c0_22], %33 {strides = array<i32>} : memref<16x128xf32, #tpu.memory_space<vmem>>, vector<1x128xf32>,
    %35 = arith.index_cast %arg0 : i32 to index
    %c4 = arith.constant 4 : index
    %36 = memref.load %arg1[%35, %c4] : memref<3x16xi32, #tpu.memory_space<smem>>
    %37 = arith.index_cast %36 : i32 to index
    %c0_23 = arith.constant 0 : index
    %38 = vector.load %arg9[%37, %c0_23] : memref<16x128xf32, #tpu.memory_space<vmem>>, vector<1x128xf32>
    %c2_24 = arith.constant 2 : index
    %c0_25 = arith.constant 0 : index
    %39 = vector.load %arg11[%c2_24, %c0_25] : memref<16x128xf32, #tpu.memory_space<vmem>>, vector<1x128xf32>
    tpu.vector_store %arg11[%c2_24, %c0_25], %38 {strides = array<i32>} : memref<16x128xf32, #tpu.memory_space<vmem>>, vector<1x128xf32>,
    %40 = arith.index_cast %36 : i32 to index
    %c0_26 = arith.constant 0 : index
    %41 = vector.load %arg10[%40, %c0_26] : memref<16x128xf32, #tpu.memory_space<vmem>>, vector<1x128xf32>
    %c2_27 = arith.constant 2 : index
    %c0_28 = arith.constant 0 : index
    %42 = vector.load %arg12[%c2_27, %c0_28] : memref<16x128xf32, #tpu.memory_space<vmem>>, vector<1x128xf32>
    tpu.vector_store %arg12[%c2_27, %c0_28], %41 {strides = array<i32>} : memref<16x128xf32, #tpu.memory_space<vmem>>, vector<1x128xf32>,
    %43 = arith.index_cast %arg0 : i32 to index
    %c5 = arith.constant 5 : index
    %44 = memref.load %arg1[%43, %c5] : memref<3x16xi32, #tpu.memory_space<smem>>
    %45 = arith.index_cast %44 : i32 to index
    %c0_29 = arith.constant 0 : index
    %46 = vector.load %arg9[%45, %c0_29] : memref<16x128xf32, #tpu.memory_space<vmem>>, vector<1x128xf32>
    %c10 = arith.constant 10 : index
    %c0_30 = arith.constant 0 : index
    %47 = vector.load %arg11[%c10, %c0_30] : memref<16x128xf32, #tpu.memory_space<vmem>>, vector<1x128xf32>
    tpu.vector_store %arg11[%c10, %c0_30], %46 {strides = array<i32>} : memref<16x128xf32, #tpu.memory_space<vmem>>, vector<1x128xf32>,
    %48 = arith.index_cast %44 : i32 to index
    %c0_31 = arith.constant 0 : index
    %49 = vector.load %arg10[%48, %c0_31] : memref<16x128xf32, #tpu.memory_space<vmem>>, vector<1x128xf32>
    %c10_32 = arith.constant 10 : index
    %c0_33 = arith.constant 0 : index
    %50 = vector.load %arg12[%c10_32, %c0_33] : memref<16x128xf32, #tpu.memory_space<vmem>>, vector<1x128xf32>
    tpu.vector_store %arg12[%c10_32, %c0_33], %49 {strides = array<i32>} : memref<16x128xf32, #tpu.memory_space<vmem>>, vector<1x128xf32>,
    %51 = arith.index_cast %arg0 : i32 to index
    %c6 = arith.constant 6 : index
    %52 = memref.load %arg1[%51, %c6] : memref<3x16xi32, #tpu.memory_space<smem>>
    %53 = arith.index_cast %52 : i32 to index
    %c0_34 = arith.constant 0 : index
    %54 = vector.load %arg9[%53, %c0_34] : memref<16x128xf32, #tpu.memory_space<vmem>>, vector<1x128xf32>
    %c3_35 = arith.constant 3 : index
    %c0_36 = arith.constant 0 : index
    %55 = vector.load %arg11[%c3_35, %c0_36] : memref<16x128xf32, #tpu.memory_space<vmem>>, vector<1x128xf32>
    tpu.vector_store %arg11[%c3_35, %c0_36], %54 {strides = array<i32>} : memref<16x128xf32, #tpu.memory_space<vmem>>, vector<1x128xf32>,
    %56 = arith.index_cast %52 : i32 to index
    %c0_37 = arith.constant 0 : index
    %57 = vector.load %arg10[%56, %c0_37] : memref<16x128xf32, #tpu.memory_space<vmem>>, vector<1x128xf32>
    %c3_38 = arith.constant 3 : index
    %c0_39 = arith.constant 0 : index
    %58 = vector.load %arg12[%c3_38, %c0_39] : memref<16x128xf32, #tpu.memory_space<vmem>>, vector<1x128xf32>
    tpu.vector_store %arg12[%c3_38, %c0_39], %57 {strides = array<i32>} : memref<16x128xf32, #tpu.memory_space<vmem>>, vector<1x128xf32>,
    %59 = arith.index_cast %arg0 : i32 to index
    %c7 = arith.constant 7 : index
    %60 = memref.load %arg1[%59, %c7] : memref<3x16xi32, #tpu.memory_space<smem>>
    %61 = arith.index_cast %60 : i32 to index
    %c0_40 = arith.constant 0 : index
    %62 = vector.load %arg9[%61, %c0_40] : memref<16x128xf32, #tpu.memory_space<vmem>>, vector<1x128xf32>
    %c11 = arith.constant 11 : index
    %c0_41 = arith.constant 0 : index
    %63 = vector.load %arg11[%c11, %c0_41] : memref<16x128xf32, #tpu.memory_space<vmem>>, vector<1x128xf32>
    tpu.vector_store %arg11[%c11, %c0_41], %62 {strides = array<i32>} : memref<16x128xf32, #tpu.memory_space<vmem>>, vector<1x128xf32>,
    %64 = arith.index_cast %60 : i32 to index
    %c0_42 = arith.constant 0 : index
    %65 = vector.load %arg10[%64, %c0_42] : memref<16x128xf32, #tpu.memory_space<vmem>>, vector<1x128xf32>
    %c11_43 = arith.constant 11 : index
    %c0_44 = arith.constant 0 : index
    %66 = vector.load %arg12[%c11_43, %c0_44] : memref<16x128xf32, #tpu.memory_space<vmem>>, vector<1x128xf32>
    tpu.vector_store %arg12[%c11_43, %c0_44], %65 {strides = array<i32>} : memref<16x128xf32, #tpu.memory_space<vmem>>, vector<1x128xf32>,
    %67 = arith.index_cast %arg0 : i32 to index
    %c8_45 = arith.constant 8 : index
    %68 = memref.load %arg1[%67, %c8_45] : memref<3x16xi32, #tpu.memory_space<smem>>
    %69 = arith.index_cast %68 : i32 to index
    %c0_46 = arith.constant 0 : index
    %70 = vector.load %arg9[%69, %c0_46] : memref<16x128xf32, #tpu.memory_space<vmem>>, vector<1x128xf32>
    %c4_47 = arith.constant 4 : index
    %c0_48 = arith.constant 0 : index
    %71 = vector.load %arg11[%c4_47, %c0_48] : memref<16x128xf32, #tpu.memory_space<vmem>>, vector<1x128xf32>
    tpu.vector_store %arg11[%c4_47, %c0_48], %70 {strides = array<i32>} : memref<16x128xf32, #tpu.memory_space<vmem>>, vector<1x128xf32>,
    %72 = arith.index_cast %68 : i32 to index
    %c0_49 = arith.constant 0 : index
    %73 = vector.load %arg10[%72, %c0_49] : memref<16x128xf32, #tpu.memory_space<vmem>>, vector<1x128xf32>
    %c4_50 = arith.constant 4 : index
    %c0_51 = arith.constant 0 : index
    %74 = vector.load %arg12[%c4_50, %c0_51] : memref<16x128xf32, #tpu.memory_space<vmem>>, vector<1x128xf32>
    tpu.vector_store %arg12[%c4_50, %c0_51], %73 {strides = array<i32>} : memref<16x128xf32, #tpu.memory_space<vmem>>, vector<1x128xf32>,
    %75 = arith.index_cast %arg0 : i32 to index
    %c9_52 = arith.constant 9 : index
    %76 = memref.load %arg1[%75, %c9_52] : memref<3x16xi32, #tpu.memory_space<smem>>
    %77 = arith.index_cast %76 : i32 to index
    %c0_53 = arith.constant 0 : index
    %78 = vector.load %arg9[%77, %c0_53] : memref<16x128xf32, #tpu.memory_space<vmem>>, vector<1x128xf32>
    %c12 = arith.constant 12 : index
    %c0_54 = arith.constant 0 : index
    %79 = vector.load %arg11[%c12, %c0_54] : memref<16x128xf32, #tpu.memory_space<vmem>>, vector<1x128xf32>
    tpu.vector_store %arg11[%c12, %c0_54], %78 {strides = array<i32>} : memref<16x128xf32, #tpu.memory_space<vmem>>, vector<1x128xf32>,
    %80 = arith.index_cast %76 : i32 to index
    %c0_55 = arith.constant 0 : index
    %81 = vector.load %arg10[%80, %c0_55] : memref<16x128xf32, #tpu.memory_space<vmem>>, vector<1x128xf32>
    %c12_56 = arith.constant 12 : index
    %c0_57 = arith.constant 0 : index
    %82 = vector.load %arg12[%c12_56, %c0_57] : memref<16x128xf32, #tpu.memory_space<vmem>>, vector<1x128xf32>
    tpu.vector_store %arg12[%c12_56, %c0_57], %81 {strides = array<i32>} : memref<16x128xf32, #tpu.memory_space<vmem>>, vector<1x128xf32>,
    %83 = arith.index_cast %arg0 : i32 to index
    %c10_58 = arith.constant 10 : index
    %84 = memref.load %arg1[%83, %c10_58] : memref<3x16xi32, #tpu.memory_space<smem>>
    %85 = arith.index_cast %84 : i32 to index
    %c0_59 = arith.constant 0 : index
    %86 = vector.load %arg9[%85, %c0_59] : memref<16x128xf32, #tpu.memory_space<vmem>>, vector<1x128xf32>
    %c5_60 = arith.constant 5 : index
    %c0_61 = arith.constant 0 : index
    %87 = vector.load %arg11[%c5_60, %c0_61] : memref<16x128xf32, #tpu.memory_space<vmem>>, vector<1x128xf32>
    tpu.vector_store %arg11[%c5_60, %c0_61], %86 {strides = array<i32>} : memref<16x128xf32, #tpu.memory_space<vmem>>, vector<1x128xf32>,
    %88 = arith.index_cast %84 : i32 to index
    %c0_62 = arith.constant 0 : index
    %89 = vector.load %arg10[%88, %c0_62] : memref<16x128xf32, #tpu.memory_space<vmem>>, vector<1x128xf32>
    %c5_63 = arith.constant 5 : index
    %c0_64 = arith.constant 0 : index
    %90 = vector.load %arg12[%c5_63, %c0_64] : memref<16x128xf32, #tpu.memory_space<vmem>>, vector<1x128xf32>
    tpu.vector_store %arg12[%c5_63, %c0_64], %89 {strides = array<i32>} : memref<16x128xf32, #tpu.memory_space<vmem>>, vector<1x128xf32>,
    %91 = arith.index_cast %arg0 : i32 to index
    %c11_65 = arith.constant 11 : index
    %92 = memref.load %arg1[%91, %c11_65] : memref<3x16xi32, #tpu.memory_space<smem>>
    %93 = arith.index_cast %92 : i32 to index
    %c0_66 = arith.constant 0 : index
    %94 = vector.load %arg9[%93, %c0_66] : memref<16x128xf32, #tpu.memory_space<vmem>>, vector<1x128xf32>
    %c13 = arith.constant 13 : index
    %c0_67 = arith.constant 0 : index
    %95 = vector.load %arg11[%c13, %c0_67] : memref<16x128xf32, #tpu.memory_space<vmem>>, vector<1x128xf32>
    tpu.vector_store %arg11[%c13, %c0_67], %94 {strides = array<i32>} : memref<16x128xf32, #tpu.memory_space<vmem>>, vector<1x128xf32>,
    %96 = arith.index_cast %92 : i32 to index
    %c0_68 = arith.constant 0 : index
    %97 = vector.load %arg10[%96, %c0_68] : memref<16x128xf32, #tpu.memory_space<vmem>>, vector<1x128xf32>
    %c13_69 = arith.constant 13 : index
    %c0_70 = arith.constant 0 : index
    %98 = vector.load %arg12[%c13_69, %c0_70] : memref<16x128xf32, #tpu.memory_space<vmem>>, vector<1x128xf32>
    tpu.vector_store %arg12[%c13_69, %c0_70], %97 {strides = array<i32>} : memref<16x128xf32, #tpu.memory_space<vmem>>, vector<1x128xf32>,
    %99 = arith.index_cast %arg0 : i32 to index
    %c12_71 = arith.constant 12 : index
    %100 = memref.load %arg1[%99, %c12_71] : memref<3x16xi32, #tpu.memory_space<smem>>
    %101 = arith.index_cast %100 : i32 to index
    %c0_72 = arith.constant 0 : index
    %102 = vector.load %arg9[%101, %c0_72] : memref<16x128xf32, #tpu.memory_space<vmem>>, vector<1x128xf32>
    %c6_73 = arith.constant 6 : index
    %c0_74 = arith.constant 0 : index
    %103 = vector.load %arg11[%c6_73, %c0_74] : memref<16x128xf32, #tpu.memory_space<vmem>>, vector<1x128xf32>
    tpu.vector_store %arg11[%c6_73, %c0_74], %102 {strides = array<i32>} : memref<16x128xf32, #tpu.memory_space<vmem>>, vector<1x128xf32>,
    %104 = arith.index_cast %100 : i32 to index
    %c0_75 = arith.constant 0 : index
    %105 = vector.load %arg10[%104, %c0_75] : memref<16x128xf32, #tpu.memory_space<vmem>>, vector<1x128xf32>
    %c6_76 = arith.constant 6 : index
    %c0_77 = arith.constant 0 : index
    %106 = vector.load %arg12[%c6_76, %c0_77] : memref<16x128xf32, #tpu.memory_space<vmem>>, vector<1x128xf32>
    tpu.vector_store %arg12[%c6_76, %c0_77], %105 {strides = array<i32>} : memref<16x128xf32, #tpu.memory_space<vmem>>, vector<1x128xf32>,
    %107 = arith.index_cast %arg0 : i32 to index
    %c13_78 = arith.constant 13 : index
    %108 = memref.load %arg1[%107, %c13_78] : memref<3x16xi32, #tpu.memory_space<smem>>
    %109 = arith.index_cast %108 : i32 to index
    %c0_79 = arith.constant 0 : index
    %110 = vector.load %arg9[%109, %c0_79] : memref<16x128xf32, #tpu.memory_space<vmem>>, vector<1x128xf32>
    %c14 = arith.constant 14 : index
    %c0_80 = arith.constant 0 : index
    %111 = vector.load %arg11[%c14, %c0_80] : memref<16x128xf32, #tpu.memory_space<vmem>>, vector<1x128xf32>
    tpu.vector_store %arg11[%c14, %c0_80], %110 {strides = array<i32>} : memref<16x128xf32, #tpu.memory_space<vmem>>, vector<1x128xf32>,
    %112 = arith.index_cast %108 : i32 to index
    %c0_81 = arith.constant 0 : index
    %113 = vector.load %arg10[%112, %c0_81] : memref<16x128xf32, #tpu.memory_space<vmem>>, vector<1x128xf32>
    %c14_82 = arith.constant 14 : index
    %c0_83 = arith.constant 0 : index
    %114 = vector.load %arg12[%c14_82, %c0_83] : memref<16x128xf32, #tpu.memory_space<vmem>>, vector<1x128xf32>
    tpu.vector_store %arg12[%c14_82, %c0_83], %113 {strides = array<i32>} : memref<16x128xf32, #tpu.memory_space<vmem>>, vector<1x128xf32>,
    %115 = arith.index_cast %arg0 : i32 to index
    %c14_84 = arith.constant 14 : index
    %116 = memref.load %arg1[%115, %c14_84] : memref<3x16xi32, #tpu.memory_space<smem>>
    %117 = arith.index_cast %116 : i32 to index
    %c0_85 = arith.constant 0 : index
    %118 = vector.load %arg9[%117, %c0_85] : memref<16x128xf32, #tpu.memory_space<vmem>>, vector<1x128xf32>
    %c7_86 = arith.constant 7 : index
    %c0_87 = arith.constant 0 : index
    %119 = vector.load %arg11[%c7_86, %c0_87] : memref<16x128xf32, #tpu.memory_space<vmem>>, vector<1x128xf32>
    tpu.vector_store %arg11[%c7_86, %c0_87], %118 {strides = array<i32>} : memref<16x128xf32, #tpu.memory_space<vmem>>, vector<1x128xf32>,
    %120 = arith.index_cast %116 : i32 to index
    %c0_88 = arith.constant 0 : index
    %121 = vector.load %arg10[%120, %c0_88] : memref<16x128xf32, #tpu.memory_space<vmem>>, vector<1x128xf32>
    %c7_89 = arith.constant 7 : index
    %c0_90 = arith.constant 0 : index
    %122 = vector.load %arg12[%c7_89, %c0_90] : memref<16x128xf32, #tpu.memory_space<vmem>>, vector<1x128xf32>
    tpu.vector_store %arg12[%c7_89, %c0_90], %121 {strides = array<i32>} : memref<16x128xf32, #tpu.memory_space<vmem>>, vector<1x128xf32>,
    %123 = arith.index_cast %arg0 : i32 to index
    %c15 = arith.constant 15 : index
    %124 = memref.load %arg1[%123, %c15] : memref<3x16xi32, #tpu.memory_space<smem>>
    %125 = arith.index_cast %124 : i32 to index
    %c0_91 = arith.constant 0 : index
    %126 = vector.load %arg9[%125, %c0_91] : memref<16x128xf32, #tpu.memory_space<vmem>>, vector<1x128xf32>
    %c15_92 = arith.constant 15 : index
    %c0_93 = arith.constant 0 : index
    %127 = vector.load %arg11[%c15_92, %c0_93] : memref<16x128xf32, #tpu.memory_space<vmem>>, vector<1x128xf32>
    tpu.vector_store %arg11[%c15_92, %c0_93], %126 {strides = array<i32>} : memref<16x128xf32, #tpu.memory_space<vmem>>, vector<1x128xf32>,
    %128 = arith.index_cast %124 : i32 to index
    %c0_94 = arith.constant 0 : index
    %129 = vector.load %arg10[%128, %c0_94] : memref<16x128xf32, #tpu.memory_space<vmem>>, vector<1x128xf32>
    %c15_95 = arith.constant 15 : index
    %c0_96 = arith.constant 0 : index
    %130 = vector.load %arg12[%c15_95, %c0_96] : memref<16x128xf32, #tpu.memory_space<vmem>>, vector<1x128xf32>
    tpu.vector_store %arg12[%c15_95, %c0_96], %129 {strides = array<i32>} : memref<16x128xf32, #tpu.memory_space<vmem>>, vector<1x128xf32>,
    %c0_97 = arith.constant 0 : index
    %c0_98 = arith.constant 0 : index
    %c0_99 = arith.constant 0 : index
    %131 = vector.load %arg3[%c0_97, %c0_98, %c0_99] : memref<1x8x128xf32, #tpu.memory_space<vmem>>, vector<1x8x128xf32>
    %132 = vector.shape_cast %131 : vector<1x8x128xf32> to vector<8x128xf32>
    %c0_100 = arith.constant 0 : index
    %c0_101 = arith.constant 0 : index
    %133 = vector.load %arg11[%c0_100, %c0_101] : memref<16x128xf32, #tpu.memory_space<vmem>>, vector<16x128xf32>
    %c0_102 = arith.constant 0 : index
    %c0_103 = arith.constant 0 : index
    %134 = vector.load %arg12[%c0_102, %c0_103] : memref<16x128xf32, #tpu.memory_space<vmem>>, vector<16x128xf32>
    %135 = vector.extract_strided_slice %133 {offsets = [0, 0], sizes = [8, 128], strides = [1, 1]} : vector<16x128xf32> to vector<8x128xf32>
    %136 = vector.extract_strided_slice %133 {offsets = [8, 0], sizes = [8, 128], strides = [1, 1]} : vector<16x128xf32> to vector<8x128xf32>
    %137 = arith.addf %135, %136 : vector<8x128xf32>
    %138 = tpu.concatenate %132, %137 in 1 : vector<8x128xf32>, vector<8x128xf32> -> vector<8x256xf32>
    %c0_104 = arith.constant 0 : index
    %c0_105 = arith.constant 0 : index
    %139 = vector.load %arg4[%c0_104, %c0_105] : memref<256x512xf32, #tpu.memory_space<vmem>>, vector<256x512xf32>
    %cst = arith.constant dense<0.000000e+00> : vector<8x512xf32>
    %140 = tpu.matmul %138, %139, %cst {dimension_numbers = #tpu.dot_dimension_numbers<[1], [0], [0], [1], [0, 0, 1, 1], [], []>} : vector<8x256xf32>, vector<256x512xf32>, vector<8x512xf32> -> vector<8x512xf32>
    %c0_106 = arith.constant 0 : index
    %c0_107 = arith.constant 0 : index
    %141 = vector.load %arg5[%c0_106, %c0_107] : memref<1x512xf32, #tpu.memory_space<vmem>>, vector<1x512xf32>
    %142 = vector.broadcast %141 : vector<1x512xf32> to vector<8x512xf32>
    %143 = arith.addf %140, %142 : vector<8x512xf32>
    %144 = vector.extract_strided_slice %143 {offsets = [0, 0], sizes = [8, 128], strides = [1, 1]} : vector<8x512xf32> to vector<8x128xf32>
    %145 = arith.negf %144 : vector<8x128xf32>
    %146 = math.exp %145 : vector<8x128xf32>
    %cst_108 = arith.constant 1.000000e+00 : f32
    %147 = vector.broadcast %cst_108 : f32 to vector<8x128xf32>
    %148 = arith.addf %147, %146 : vector<8x128xf32>
    %149 = arith.divf %147, %148 : vector<8x128xf32>
    %150 = vector.extract_strided_slice %143 {offsets = [0, 128], sizes = [8, 128], strides = [1, 1]} : vector<8x512xf32> to vector<8x128xf32>
    %151 = arith.negf %150 : vector<8x128xf32>
    %152 = math.exp %151 : vector<8x128xf32>
    %cst_109 = arith.constant 1.000000e+00 : f32
    %153 = vector.broadcast %cst_109 : f32 to vector<8x128xf32>
    %154 = arith.addf %153, %152 : vector<8x128xf32>
    %155 = arith.divf %153, %154 : vector<8x128xf32>
    %156 = vector.extract_strided_slice %143 {offsets = [0, 256], sizes = [8, 128], strides = [1, 1]} : vector<8x512xf32> to vector<8x128xf32>
    %157 = math.tanh %156 : vector<8x128xf32>
    %158 = vector.extract_strided_slice %143 {offsets = [0, 384], sizes = [8, 128], strides = [1, 1]} : vector<8x512xf32> to vector<8x128xf32>
    %c0_110 = arith.constant 0 : index
    %c0_111 = arith.constant 0 : index
    %159 = vector.load %arg6[%c0_110, %c0_111] : memref<128x128xf32, #tpu.memory_space<vmem>>, vector<128x128xf32>
    %160 = vector.extract_strided_slice %133 {offsets = [0, 0], sizes = [8, 128], strides = [1, 1]} : vector<16x128xf32> to vector<8x128xf32>
    %161 = vector.extract_strided_slice %134 {offsets = [0, 0], sizes = [8, 128], strides = [1, 1]} : vector<16x128xf32> to vector<8x128xf32>
    %cst_112 = arith.constant dense<0.000000e+00> : vector<8x128xf32>
    %162 = tpu.matmul %160, %159, %cst_112 {dimension_numbers = #tpu.dot_dimension_numbers<[1], [0], [0], [1], [0, 0, 1, 1], [], []>} : vector<8x128xf32>, vector<128x128xf32>, vector<8x128xf32> -> vector<8x128xf32>
    %163 = arith.addf %162, %158 : vector<8x128xf32>
    %164 = arith.negf %163 : vector<8x128xf32>
    %165 = math.exp %164 : vector<8x128xf32>
    %cst_113 = arith.constant 1.000000e+00 : f32
    %166 = vector.broadcast %cst_113 : f32 to vector<8x128xf32>
    %167 = arith.addf %166, %165 : vector<8x128xf32>
    %168 = arith.divf %166, %167 : vector<8x128xf32>
    %169 = arith.mulf %168, %161 : vector<8x128xf32>
    %170 = vector.extract_strided_slice %133 {offsets = [8, 0], sizes = [8, 128], strides = [1, 1]} : vector<16x128xf32> to vector<8x128xf32>
    %171 = vector.extract_strided_slice %134 {offsets = [8, 0], sizes = [8, 128], strides = [1, 1]} : vector<16x128xf32> to vector<8x128xf32>
    %cst_114 = arith.constant dense<0.000000e+00> : vector<8x128xf32>
    %172 = tpu.matmul %170, %159, %cst_114 {dimension_numbers = #tpu.dot_dimension_numbers<[1], [0], [0], [1], [0, 0, 1, 1], [], []>} : vector<8x128xf32>, vector<128x128xf32>, vector<8x128xf32> -> vector<8x128xf32>
    %173 = arith.addf %172, %158 : vector<8x128xf32>
    %174 = arith.negf %173 : vector<8x128xf32>
    %175 = math.exp %174 : vector<8x128xf32>
    %cst_115 = arith.constant 1.000000e+00 : f32
    %176 = vector.broadcast %cst_115 : f32 to vector<8x128xf32>
    %177 = arith.addf %176, %175 : vector<8x128xf32>
    %178 = arith.divf %176, %177 : vector<8x128xf32>
    %179 = arith.mulf %178, %171 : vector<8x128xf32>
    %180 = arith.addf %169, %179 : vector<8x128xf32>
    %181 = arith.mulf %149, %157 : vector<8x128xf32>
    %182 = arith.addf %181, %180 : vector<8x128xf32>
    %183 = math.tanh %182 : vector<8x128xf32>
    %184 = arith.mulf %155, %183 : vector<8x128xf32>
    %185 = arith.index_cast %arg0 : i32 to index
    %c0_116 = arith.constant 0 : index
    %186 = memref.load %arg2[%185, %c0_116] : memref<3x8xi32, #tpu.memory_space<smem>>
    %187 = vector.extract_strided_slice %182 {offsets = [0, 0], sizes = [1, 128], strides = [1, 1]} : vector<8x128xf32> to vector<1x128xf32>
    %188 = arith.index_cast %186 : i32 to index
    %c0_117 = arith.constant 0 : index
    %189 = vector.load %arg9[%188, %c0_117] : memref<16x128xf32, #tpu.memory_space<vmem>>, vector<1x128xf32>
    tpu.vector_store %arg9[%188, %c0_117], %187 {strides = array<i32>} : memref<16x128xf32, #tpu.memory_space<vmem>>, vector<1x128xf32>,
    %190 = vector.extract_strided_slice %184 {offsets = [0, 0], sizes = [1, 128], strides = [1, 1]} : vector<8x128xf32> to vector<1x128xf32>
    %191 = arith.index_cast %186 : i32 to index
    %c0_118 = arith.constant 0 : index
    %192 = vector.load %arg10[%191, %c0_118] : memref<16x128xf32, #tpu.memory_space<vmem>>, vector<1x128xf32>
    tpu.vector_store %arg10[%191, %c0_118], %190 {strides = array<i32>} : memref<16x128xf32, #tpu.memory_space<vmem>>, vector<1x128xf32>,
    %193 = arith.index_cast %arg0 : i32 to index
    %c1_119 = arith.constant 1 : index
    %194 = memref.load %arg2[%193, %c1_119] : memref<3x8xi32, #tpu.memory_space<smem>>
    %195 = vector.extract_strided_slice %182 {offsets = [1, 0], sizes = [1, 128], strides = [1, 1]} : vector<8x128xf32> to vector<1x128xf32>
    %196 = arith.index_cast %194 : i32 to index
    %c0_120 = arith.constant 0 : index
    %197 = vector.load %arg9[%196, %c0_120] : memref<16x128xf32, #tpu.memory_space<vmem>>, vector<1x128xf32>
    tpu.vector_store %arg9[%196, %c0_120], %195 {strides = array<i32>} : memref<16x128xf32, #tpu.memory_space<vmem>>, vector<1x128xf32>,
    %198 = vector.extract_strided_slice %184 {offsets = [1, 0], sizes = [1, 128], strides = [1, 1]} : vector<8x128xf32> to vector<1x128xf32>
    %199 = arith.index_cast %194 : i32 to index
    %c0_121 = arith.constant 0 : index
    %200 = vector.load %arg10[%199, %c0_121] : memref<16x128xf32, #tpu.memory_space<vmem>>, vector<1x128xf32>
    tpu.vector_store %arg10[%199, %c0_121], %198 {strides = array<i32>} : memref<16x128xf32, #tpu.memory_space<vmem>>, vector<1x128xf32>,
    %201 = arith.index_cast %arg0 : i32 to index
    %c2_122 = arith.constant 2 : index
    %202 = memref.load %arg2[%201, %c2_122] : memref<3x8xi32, #tpu.memory_space<smem>>
    %203 = vector.extract_strided_slice %182 {offsets = [2, 0], sizes = [1, 128], strides = [1, 1]} : vector<8x128xf32> to vector<1x128xf32>
    %204 = arith.index_cast %202 : i32 to index
    %c0_123 = arith.constant 0 : index
    %205 = vector.load %arg9[%204, %c0_123] : memref<16x128xf32, #tpu.memory_space<vmem>>, vector<1x128xf32>
    tpu.vector_store %arg9[%204, %c0_123], %203 {strides = array<i32>} : memref<16x128xf32, #tpu.memory_space<vmem>>, vector<1x128xf32>,
    %206 = vector.extract_strided_slice %184 {offsets = [2, 0], sizes = [1, 128], strides = [1, 1]} : vector<8x128xf32> to vector<1x128xf32>
    %207 = arith.index_cast %202 : i32 to index
    %c0_124 = arith.constant 0 : index
    %208 = vector.load %arg10[%207, %c0_124] : memref<16x128xf32, #tpu.memory_space<vmem>>, vector<1x128xf32>
    tpu.vector_store %arg10[%207, %c0_124], %206 {strides = array<i32>} : memref<16x128xf32, #tpu.memory_space<vmem>>, vector<1x128xf32>,
    %209 = arith.index_cast %arg0 : i32 to index
    %c3_125 = arith.constant 3 : index
    %210 = memref.load %arg2[%209, %c3_125] : memref<3x8xi32, #tpu.memory_space<smem>>
    %211 = vector.extract_strided_slice %182 {offsets = [3, 0], sizes = [1, 128], strides = [1, 1]} : vector<8x128xf32> to vector<1x128xf32>
    %212 = arith.index_cast %210 : i32 to index
    %c0_126 = arith.constant 0 : index
    %213 = vector.load %arg9[%212, %c0_126] : memref<16x128xf32, #tpu.memory_space<vmem>>, vector<1x128xf32>
    tpu.vector_store %arg9[%212, %c0_126], %211 {strides = array<i32>} : memref<16x128xf32, #tpu.memory_space<vmem>>, vector<1x128xf32>,
    %214 = vector.extract_strided_slice %184 {offsets = [3, 0], sizes = [1, 128], strides = [1, 1]} : vector<8x128xf32> to vector<1x128xf32>
    %215 = arith.index_cast %210 : i32 to index
    %c0_127 = arith.constant 0 : index
    %216 = vector.load %arg10[%215, %c0_127] : memref<16x128xf32, #tpu.memory_space<vmem>>, vector<1x128xf32>
    tpu.vector_store %arg10[%215, %c0_127], %214 {strides = array<i32>} : memref<16x128xf32, #tpu.memory_space<vmem>>, vector<1x128xf32>,
    %217 = arith.index_cast %arg0 : i32 to index
    %c4_128 = arith.constant 4 : index
    %218 = memref.load %arg2[%217, %c4_128] : memref<3x8xi32, #tpu.memory_space<smem>>
    %219 = vector.extract_strided_slice %182 {offsets = [4, 0], sizes = [1, 128], strides = [1, 1]} : vector<8x128xf32> to vector<1x128xf32>
    %220 = arith.index_cast %218 : i32 to index
    %c0_129 = arith.constant 0 : index
    %221 = vector.load %arg9[%220, %c0_129] : memref<16x128xf32, #tpu.memory_space<vmem>>, vector<1x128xf32>
    tpu.vector_store %arg9[%220, %c0_129], %219 {strides = array<i32>} : memref<16x128xf32, #tpu.memory_space<vmem>>, vector<1x128xf32>,
    %222 = vector.extract_strided_slice %184 {offsets = [4, 0], sizes = [1, 128], strides = [1, 1]} : vector<8x128xf32> to vector<1x128xf32>
    %223 = arith.index_cast %218 : i32 to index
    %c0_130 = arith.constant 0 : index
    %224 = vector.load %arg10[%223, %c0_130] : memref<16x128xf32, #tpu.memory_space<vmem>>, vector<1x128xf32>
    tpu.vector_store %arg10[%223, %c0_130], %222 {strides = array<i32>} : memref<16x128xf32, #tpu.memory_space<vmem>>, vector<1x128xf32>,
    %225 = arith.index_cast %arg0 : i32 to index
    %c5_131 = arith.constant 5 : index
    %226 = memref.load %arg2[%225, %c5_131] : memref<3x8xi32, #tpu.memory_space<smem>>
    %227 = vector.extract_strided_slice %182 {offsets = [5, 0], sizes = [1, 128], strides = [1, 1]} : vector<8x128xf32> to vector<1x128xf32>
    %228 = arith.index_cast %226 : i32 to index
    %c0_132 = arith.constant 0 : index
    %229 = vector.load %arg9[%228, %c0_132] : memref<16x128xf32, #tpu.memory_space<vmem>>, vector<1x128xf32>
    tpu.vector_store %arg9[%228, %c0_132], %227 {strides = array<i32>} : memref<16x128xf32, #tpu.memory_space<vmem>>, vector<1x128xf32>,
    %230 = vector.extract_strided_slice %184 {offsets = [5, 0], sizes = [1, 128], strides = [1, 1]} : vector<8x128xf32> to vector<1x128xf32>
    %231 = arith.index_cast %226 : i32 to index
    %c0_133 = arith.constant 0 : index
    %232 = vector.load %arg10[%231, %c0_133] : memref<16x128xf32, #tpu.memory_space<vmem>>, vector<1x128xf32>
    tpu.vector_store %arg10[%231, %c0_133], %230 {strides = array<i32>} : memref<16x128xf32, #tpu.memory_space<vmem>>, vector<1x128xf32>,
    %233 = arith.index_cast %arg0 : i32 to index
    %c6_134 = arith.constant 6 : index
    %234 = memref.load %arg2[%233, %c6_134] : memref<3x8xi32, #tpu.memory_space<smem>>
    %235 = vector.extract_strided_slice %182 {offsets = [6, 0], sizes = [1, 128], strides = [1, 1]} : vector<8x128xf32> to vector<1x128xf32>
    %236 = arith.index_cast %234 : i32 to index
    %c0_135 = arith.constant 0 : index
    %237 = vector.load %arg9[%236, %c0_135] : memref<16x128xf32, #tpu.memory_space<vmem>>, vector<1x128xf32>
    tpu.vector_store %arg9[%236, %c0_135], %235 {strides = array<i32>} : memref<16x128xf32, #tpu.memory_space<vmem>>, vector<1x128xf32>,
    %238 = vector.extract_strided_slice %184 {offsets = [6, 0], sizes = [1, 128], strides = [1, 1]} : vector<8x128xf32> to vector<1x128xf32>
    %239 = arith.index_cast %234 : i32 to index
    %c0_136 = arith.constant 0 : index
    %240 = vector.load %arg10[%239, %c0_136] : memref<16x128xf32, #tpu.memory_space<vmem>>, vector<1x128xf32>
    tpu.vector_store %arg10[%239, %c0_136], %238 {strides = array<i32>} : memref<16x128xf32, #tpu.memory_space<vmem>>, vector<1x128xf32>,
    %241 = arith.index_cast %arg0 : i32 to index
    %c7_137 = arith.constant 7 : index
    %242 = memref.load %arg2[%241, %c7_137] : memref<3x8xi32, #tpu.memory_space<smem>>
    %243 = vector.extract_strided_slice %182 {offsets = [7, 0], sizes = [1, 128], strides = [1, 1]} : vector<8x128xf32> to vector<1x128xf32>
    %244 = arith.index_cast %242 : i32 to index
    %c0_138 = arith.constant 0 : index
    %245 = vector.load %arg9[%244, %c0_138] : memref<16x128xf32, #tpu.memory_space<vmem>>, vector<1x128xf32>
    tpu.vector_store %arg9[%244, %c0_138], %243 {strides = array<i32>} : memref<16x128xf32, #tpu.memory_space<vmem>>, vector<1x128xf32>,
    %246 = vector.extract_strided_slice %184 {offsets = [7, 0], sizes = [1, 128], strides = [1, 1]} : vector<8x128xf32> to vector<1x128xf32>
    %247 = arith.index_cast %242 : i32 to index
    %c0_139 = arith.constant 0 : index
    %248 = vector.load %arg10[%247, %c0_139] : memref<16x128xf32, #tpu.memory_space<vmem>>, vector<1x128xf32>
    tpu.vector_store %arg10[%247, %c0_139], %246 {strides = array<i32>} : memref<16x128xf32, #tpu.memory_space<vmem>>, vector<1x128xf32>,
    %c2_i32 = arith.constant 2 : i32
    %249 = arith.cmpi eq, %arg0, %c2_i32 : i32
    %250 = arith.extui %249 : i1 to i32
    %c0_i32_140 = arith.constant 0 : i32
    %251 = arith.cmpi ne, %250, %c0_i32_140 : i32
    scf.if %251 {
      %c0_141 = arith.constant 0 : index
      %c0_142 = arith.constant 0 : index
      %252 = vector.load %arg9[%c0_141, %c0_142] : memref<16x128xf32, #tpu.memory_space<vmem>>, vector<16x128xf32>
      %c0_143 = arith.constant 0 : index
      %c0_144 = arith.constant 0 : index
      %253 = vector.load %arg7[%c0_143, %c0_144] : memref<16x128xf32, #tpu.memory_space<vmem>>, vector<16x128xf32>
      tpu.vector_store %arg7[%c0_143, %c0_144], %252 {strides = array<i32>} : memref<16x128xf32, #tpu.memory_space<vmem>>, vector<16x128xf32>,
      %c0_145 = arith.constant 0 : index
      %c0_146 = arith.constant 0 : index
      %254 = vector.load %arg10[%c0_145, %c0_146] : memref<16x128xf32, #tpu.memory_space<vmem>>, vector<16x128xf32>
      %c0_147 = arith.constant 0 : index
      %c0_148 = arith.constant 0 : index
      %255 = vector.load %arg8[%c0_147, %c0_148] : memref<16x128xf32, #tpu.memory_space<vmem>>, vector<16x128xf32>
      tpu.vector_store %arg8[%c0_147, %c0_148], %254 {strides = array<i32>} : memref<16x128xf32, #tpu.memory_space<vmem>>, vector<16x128xf32>,
    } else {
    }
    return
  }
  func.func @transform_0(%arg0: i32, %arg1: memref<3x16xi32, #tpu.memory_space<smem>>, %arg2: memref<3x8xi32, #tpu.memory_space<smem>>) -> (i32, i32, i32) {
    %c0_i32 = arith.constant 0 : i32
    %c0_i32_0 = arith.constant 0 : i32
    %c0_i32_1 = arith.constant 0 : i32
    return %arg0, %c0_i32, %c0_i32_0 : i32, i32, i32
  }
  func.func @transform_1(%arg0: i32, %arg1: memref<3x16xi32, #tpu.memory_space<smem>>, %arg2: memref<3x8xi32, #tpu.memory_space<smem>>) -> (i32, i32) {
    %c0_i32 = arith.constant 0 : i32
    %c0_i32_0 = arith.constant 0 : i32
    %c0_i32_1 = arith.constant 0 : i32
    return %c0_i32, %c0_i32_0 : i32, i32
  }
  func.func @transform_2(%arg0: i32, %arg1: memref<3x16xi32, #tpu.memory_space<smem>>, %arg2: memref<3x8xi32, #tpu.memory_space<smem>>) -> (i32, i32) {
    %c0_i32 = arith.constant 0 : i32
    %c0_i32_0 = arith.constant 0 : i32
    %c0_i32_1 = arith.constant 0 : i32
    return %c0_i32, %c0_i32_0 : i32, i32
  }
  func.func @transform_3(%arg0: i32, %arg1: memref<3x16xi32, #tpu.memory_space<smem>>, %arg2: memref<3x8xi32, #tpu.memory_space<smem>>) -> (i32, i32) {
    %c0_i32 = arith.constant 0 : i32
    %c0_i32_0 = arith.constant 0 : i32
    %c0_i32_1 = arith.constant 0 : i32
    return %c0_i32, %c0_i32_0 : i32, i32
  }
  func.func @transform_4(%arg0: i32, %arg1: memref<3x16xi32, #tpu.memory_space<smem>>, %arg2: memref<3x8xi32, #tpu.memory_space<smem>>) -> (i32, i32) {
    %c0_i32 = arith.constant 0 : i32
    %c0_i32_0 = arith.constant 0 : i32
    %c0_i32_1 = arith.constant 0 : i32
    return %c0_i32, %c0_i32_0 : i32, i32
  }
  func.func @transform_5(%arg0: i32, %arg1: memref<3x16xi32, #tpu.memory_space<smem>>, %arg2: memref<3x8xi32, #tpu.memory_space<smem>>) -> (i32, i32) {
    %c0_i32 = arith.constant 0 : i32
    %c0_i32_0 = arith.constant 0 : i32
    %c0_i32_1 = arith.constant 0 : i32
    return %c0_i32, %c0_i32_0 : i32, i32
  }
}

</mosaic_0001>

<bundles_post_ra>
// kernel: tree_lstm_device.1
= control target key start
LH: loop header
LB: loop body
LE: loop exit
PB: predicated region body
PF: predicated region fallthrough
CT: control target
= control target key end

     0   :  { %s2081_s0 = inlined_call_operand.vmem [shape: s32[3,16], index: 0, kind: input, shape index: {}]   ;;  %s2082_s2 = inlined_call_operand.vmem [shape: f32[3,8,128], index: 2, kind: input, shape index: {}]   ;;  %s2083_s3 = inlined_call_operand.vmem [shape: f32[256,512], index: 3, kind: input, shape index: {}]   ;;  %s2084_s4 = inlined_call_operand.vmem [shape: f32[1,512], index: 4, kind: input, shape index: {}]   ;;  %s2085_s5 = inlined_call_operand.vmem [shape: f32[128,128], index: 5, kind: input, shape index: {}]   ;;  %s2086_s6 = inlined_call_operand.vmem [shape: f32[16,128], index: 6, kind: output, shape index: {0}]   ;;  %s2087_s7 = inlined_call_operand.vmem [shape: f32[16,128], index: 7, kind: output, shape index: {1}]   ;;  %s2088_s1 = inlined_call_operand.vmem [shape: s32[3,8], index: 1, kind: input, shape index: {}]  }
   0x1   :  { %2102 = sst [smem:[#allocation13_spill]] %s2082_s2  ;;  %s13_s26 = sshll.u32 %s2081_s0, 4  ;;  %s14_s26 = int_to_ptr.vmem [resolvable:$true] %s13_s26 }
   0x2   :  { %2103 = sst [smem:[#allocation14_spill]] %s2086_s6  ;;  %s17_s29 = sshll.u32 %s2088_s1, 4  ;;  %s18_s29 = int_to_ptr.vmem [resolvable:$true] %s17_s29 }
   0x3   :  { %2104 = sst [smem:[#allocation15_spill]] %s2087_s7  ;;  %s1301_s30 = scalar_lea.vmem %s14_s26, 64 }
   0x4   :  { %p1302_p0 = scmp.ne.s32.totalorder %s14_s26, %s1301_s30  ;;  %p1306_p1 = scmp.lt.s32.totalorder %s14_s26, %s14_s26 }
   0x5   :  { %p1307_p2 = scmp.lt.s32.totalorder %s1301_s30, %s1301_s30 }
   0x7   :  { %p1308_p3 = por %p1307_p2, %p1306_p1 }
   0x9   :  { %p1309_p4 = pnand %p1308_p3, %p1302_p0 }
   0xb   :  { %1312 = shalt.err (!%p1309_p4)  }
   0xc   :  { %s1335_s8 = smov [#allocation7]   ;;  %s1313_s9 = scalar_lea.vmem %s18_s29, 64 }
   0xd   :  { %16 = dma.vmem_to_smem %s14_s26, 64, %s1335_s8, [#allocation6] }
   0xe   :  { %p1314_p5 = scmp.ne.s32.totalorder %s18_s29, %s1313_s9  ;;  %p1318_p6 = scmp.lt.s32.totalorder %s18_s29, %s18_s29 }
   0xf   :  { %p1319_p7 = scmp.lt.s32.totalorder %s1313_s9, %s1313_s9 }
  0x11   :  { %p1320_p8 = por %p1319_p7, %p1318_p6 }
  0x13   :  { %p1321_p9 = pnand %p1320_p8, %p1314_p5 }
  0x15   :  { %1324 = shalt.err (!%p1321_p9)  }
  0x16   :  { %s1336_s0 = smov [#allocation8]  }
  0x17   :  { %20 = dma.vmem_to_smem %s18_s29, 64, %s1336_s0, [#allocation6] }
  0x18   :  { %1329 = dma.done.wait [#allocation6], 128 }
  0x19   :  { %1330 = vsyncadd [#allocation6], 4294967168 }
  0x1a   :  { %22 = sfence }
  0x1b   :  { %s1387_s1 = smov 0  }
  0x1c LB: > { %2105 = sst [smem:[#allocation10_spill]] %s1333_s1  ;;  %s1393_s10 = sadd.s32 4294967295, %s1333_s1   ;;  %s1333_s1 = sphi %s1387_s1, %s28_s1  }
  0x1d   : > { %2106 = sst [smem:[#allocation11_spill]] %s1393_s10  ;;  %p976_p10 = scmp.ge.s32.totalorder %s1333_s1, 1 }
  0x1e   : > { %p191_p11 = scmp.lt.s32.totalorder %s1333_s1, 4 }
  0x20   : > { %p192_p12 = pnand %p976_p10, %p191_p11 }
  0x22   : > { %195 = sbr.rel (%p192_p12) target bundleno = 438 (0x1b6), region = 36 }
  0x29   : > { %p213_p13 = scmp.lt.s32.totalorder %s1393_s10, 2  ;;  %s2107_s2 = sld [smem:[#allocation13_spill]] }
  0x2a   : > { %p978_p0 = scmp.ne.s32.totalorder %s1393_s10, 0 }
  0x2b   : > { %s214_s11 = scalar_select %p213_p13, %s1393_s10, 2 }
  0x2c   : > { %220 = sbr.rel (%p978_p0) target bundleno = 51 (0x33), region = 40  ;;  %v1337_v0 = vmov (!%p978_p0), 0.0  }
  0x2d   : > { %s977_s12 = sshll.u32 %s214_s11, 3  ;;  %221 = vst [vmem:[#allocation2] sm:$0xff] (!%p978_p0), %v1337_v0  ;;  %222 = vst [vmem:[#allocation2 + $0x8] sm:$0xff] (!%p978_p0), %v1337_v0 }
  0x2e   : > { %223 = vst [vmem:[#allocation3] sm:$0xff] (!%p978_p0), %v1337_v0  ;;  %224 = vst [vmem:[#allocation3 + $0x8] sm:$0xff] (!%p978_p0), %v1337_v0 }
  0x2f   : > { %s1402_s15 = scalar_lea.vmem %s2107_s2, %s977_s12 }
  0x33 PF: > { %v360_v1 = vld [vmem:[%s2083_s3 + $0x8] sm:$0xff]  ;;  %v362_v3 = vld [vmem:[%s2083_s3 + $0x18] sm:$0xff]  ;;  %v359_v6 = vld [vmem:[%s2083_s3] sm:$0xff]  ;;  %s1451_s24 = sshll.u32 %s1393_s10, 7  ;;  %vm1339_vm0 = vmmov 0  }
  0x34   : > { %v364_v2 = vld [vmem:[%s2083_s3 + $0x28] sm:$0xff]  ;;  %v366_v5 = vld [vmem:[%s2083_s3 + $0x38] sm:$0xff]  ;;  %v363_v7 = vld [vmem:[%s2083_s3 + $0x20] sm:$0xff]  ;;  %2108 = sst [smem:[#allocation12_spill]] %s1451_s24  ;;  %s2094_s21 = sadd.s32 1, %s1451_s24 }
  0x35   : > { %v1091_v4 = vpack.c.bf16 %v364_v2, %v360_v1  ;;  %v1155_v8 = vpack.c.bf16 %v366_v5, %v362_v3  ;;  %v1093_v9 = vpack.c.bf16 %v363_v7, %v359_v6  ;;  %v361_v10 = vld [vmem:[%s2083_s3 + $0x10] sm:$0xff]  ;;  %v368_v12 = vld [vmem:[%s2083_s3 + $0x48] sm:$0xff]  ;;  %v370_v15 = vld [vmem:[%s2083_s3 + $0x58] sm:$0xff]  ;;  %s2093_s29 = sadd.s32 2, %s1451_s24  ;;  %s1501_s13 = sld [smem:[#allocation7 + %s1451_s24]] }
  0x36   : > { %v365_v11 = vld [vmem:[%s2083_s3 + $0x30] sm:$0xff]  ;;  %v372_v14 = vld [vmem:[%s2083_s3 + $0x68] sm:$0xff]  ;;  %v374_v16 = vld [vmem:[%s2083_s3 + $0x78] sm:$0xff]  ;;  %s2092_s14 = sadd.s32 3, %s1451_s24  ;;  %s1515_s23 = sld [smem:[#allocation7 + %s2094_s21]] }
  0x37   : > { %1092 = vmatprep.subr.bf16.mxu0 %v1091_v4  ;;  %v1157_v13 = vpack.c.bf16 %v365_v11, %v361_v10  ;;  %1156 = vmatprep.subr.bf16.mxu1 %v1155_v8  ;;  %v1095_v17 = vpack.c.bf16 %v372_v14, %v368_v12  ;;  %v1159_v18 = vpack.c.bf16 %v374_v16, %v370_v15  ;;  %v367_v19 = vld [vmem:[%s2083_s3 + $0x40] sm:$0xff]  ;;  %v369_v21 = vld [vmem:[%s2083_s3 + $0x50] sm:$0xff]  ;;  %v376_v24 = vld [vmem:[%s2083_s3 + $0x88] sm:$0xff]  ;;  %s2091_s25 = sadd.s32 4, %s1451_s24  ;;  %s1529_s0 = sld [smem:[#allocation7 + %s2093_s29]] }
  0x38   : > { %1094 = vmatpush1.bf16.msra.mxu0 %v1093_v9  ;;  %v371_v20 = vld [vmem:[%s2083_s3 + $0x60] sm:$0xff]  ;;  %v373_v23 = vld [vmem:[%s2083_s3 + $0x70] sm:$0xff]  ;;  %v380_v25 = vld [vmem:[%s2083_s3 + $0xa8] sm:$0xff]  ;;  %s1533_s11 = sld [smem:[#allocation7 + %s2092_s14]]  ;;  %s2089_s12 = sadd.s32 5, %s1451_s24 }
  0x39   : > { %1158 = vmatpush1.bf16.msra.mxu1 %v1157_v13  ;;  %v1097_v22 = vpack.c.bf16 %v371_v20, %v367_v19  ;;  %1096 = vmatprep.subr.bf16.mxu0 %v1095_v17  ;;  %v1161_v26 = vpack.c.bf16 %v373_v23, %v369_v21  ;;  %v1099_v27 = vpack.c.bf16 %v380_v25, %v376_v24  ;;  %v378_v28 = vld [vmem:[%s2083_s3 + $0x98] sm:$0xff]  ;;  %v375_v30 = vld [vmem:[%s2083_s3 + $0x80] sm:$0xff]  ;;  %v377_v33 = vld [vmem:[%s2083_s3 + $0x90] sm:$0xff]  ;;  %s1547_s26 = sld [smem:[#allocation7 + %s2091_s25]]  ;;  %s2090_s17 = sadd.s32 6, %s1451_s24 }
  0x3a   : > { %1160 = vmatprep.subr.bf16.mxu1 %v1159_v18  ;;  %v382_v29 = vld [vmem:[%s2083_s3 + $0xb8] sm:$0xff]  ;;  %v379_v32 = vld [vmem:[%s2083_s3 + $0xa0] sm:$0xff]  ;;  %v381_v34 = vld [vmem:[%s2083_s3 + $0xb0] sm:$0xff]  ;;  %s1566_s22 = sld [smem:[#allocation7 + %s2089_s12]]  ;;  %s2095_s20 = sadd.s32 7, %s1451_s24 }
  0x3b   : > { %v1163_v31 = vpack.c.bf16 %v382_v29, %v378_v28  ;;  %v1101_v35 = vpack.c.bf16 %v379_v32, %v375_v30  ;;  %v384_v36 = vld [vmem:[%s2083_s3 + $0xc8] sm:$0xff]  ;;  %v386_v38 = vld [vmem:[%s2083_s3 + $0xd8] sm:$0xff]  ;;  %v1165_v39 = vpack.c.bf16 %v381_v34, %v377_v33  ;;  %v383_v42 = vld [vmem:[%s2083_s3 + $0xc0] sm:$0xff]  ;;  %s1613_s19 = sld [smem:[#allocation7 + %s2090_s17]]  ;;  %s289_s9 = sadd.s32 8, %s1451_s24 }
  0x3c   : > { %1098 = vmatpush1.bf16.msra.mxu0 %v1097_v22  ;;  %v388_v37 = vld [vmem:[%s2083_s3 + $0xe8] sm:$0xff]  ;;  %v390_v41 = vld [vmem:[%s2083_s3 + $0xf8] sm:$0xff]  ;;  %v387_v43 = vld [vmem:[%s2083_s3 + $0xe0] sm:$0xff]  ;;  %s297_s16 = sadd.s32 9, %s1451_s24  ;;  %s1635_s8 = sld [smem:[#allocation7 + %s2095_s20]] }
  0x3d   : > { %1162 = vmatpush1.bf16.msra.mxu1 %v1161_v26  ;;  %1100 = vmatprep.subr.bf16.mxu0 %v1099_v27  ;;  %v1103_v40 = vpack.c.bf16 %v388_v37, %v384_v36  ;;  %v1167_v44 = vpack.c.bf16 %v390_v41, %v386_v38  ;;  %v385_v45 = vld [vmem:[%s2083_s3 + $0xd0] sm:$0xff]  ;;  %v392_v47 = vld [vmem:[%s2083_s3 + $0x108] sm:$0xff]  ;;  %v394_v49 = vld [vmem:[%s2083_s3 + $0x118] sm:$0xff]  ;;  %v1105_v51 = vpack.c.bf16 %v387_v43, %v383_v42  ;;  %s305_s25 = sadd.s32 10, %s1451_s24  ;;  %s313_s28 = sadd.s32 11, %s1451_s24 }
  0x3e   : > { %1164 = vmatprep.subr.bf16.mxu1 %v1163_v31  ;;  %v389_v46 = vld [vmem:[%s2083_s3 + $0xf0] sm:$0xff]  ;;  %v396_v48 = vld [vmem:[%s2083_s3 + $0x128] sm:$0xff]  ;;  %v398_v50 = vld [vmem:[%s2083_s3 + $0x138] sm:$0xff]  ;;  %s1654_s29 = sld [smem:[#allocation7 + %s289_s9]]  ;;  %s321_s18 = sadd.s32 12, %s1451_s24 }
  0x3f   : > { %v1169_v52 = vpack.c.bf16 %v389_v46, %v385_v45  ;;  %v1107_v53 = vpack.c.bf16 %v396_v48, %v392_v47  ;;  %v391_v54 = vld [vmem:[%s2083_s3 + $0x100] sm:$0xff]  ;;  %v393_v56 = vld [vmem:[%s2083_s3 + $0x110] sm:$0xff]  ;;  %v1171_v57 = vpack.c.bf16 %v398_v50, %v394_v49  ;;  %v400_v59 = vld [vmem:[%s2083_s3 + $0x148] sm:$0xff]  ;;  %s1656_s14 = sld [smem:[#allocation7 + %s297_s16]]  ;;  %s329_s27 = sadd.s32 13, %s1451_s24 }
  0x40   : > { %1102 = vmatpush1.bf16.msra.mxu0 %v1101_v35  ;;  %v395_v55 = vld [vmem:[%s2083_s3 + $0x120] sm:$0xff]  ;;  %v397_v58 = vld [vmem:[%s2083_s3 + $0x130] sm:$0xff]  ;;  %v404_v60 = vld [vmem:[%s2083_s3 + $0x168] sm:$0xff]  ;;  %s1658_s12 = sld [smem:[#allocation7 + %s305_s25]]  ;;  %s337_s20 = sadd.s32 14, %s1451_s24 }
  0x41   : > { %1166 = vmatpush1.bf16.msra.mxu1 %v1165_v39  ;;  %1104 = vmatprep.subr.bf16.mxu0 %v1103_v40  ;;  %v402_v61 = vld [vmem:[%s2083_s3 + $0x158] sm:$0xff]  ;;  %v1109_v63 = vpack.c.bf16 %v395_v55, %v391_v54  ;;  %v1173_v0 = vpack.c.bf16 %v397_v58, %v393_v56  ;;  %v1111_v1 = vpack.c.bf16 %v404_v60, %v400_v59  ;;  %v399_v2 = vld [vmem:[%s2083_s3 + $0x140] sm:$0xff]  ;;  %v401_v4 = vld [vmem:[%s2083_s3 + $0x150] sm:$0xff]  ;;  %s1670_s25 = sld [smem:[#allocation7 + %s313_s28]]  ;;  %s345_s1 = sadd.s32 15, %s1451_s24 }
  0x42   : > { %1168 = vmatprep.subr.bf16.mxu1 %v1167_v44  ;;  %v406_v62 = vld [vmem:[%s2083_s3 + $0x178] sm:$0xff]  ;;  %v403_v3 = vld [vmem:[%s2083_s3 + $0x160] sm:$0xff]  ;;  %v405_v6 = vld [vmem:[%s2083_s3 + $0x170] sm:$0xff]  ;;  %s1689_s10 = sld [smem:[#allocation7 + %s321_s18]]  ;;  %s227_s18 = scalar_lea.vmem [#allocation2], %s1501_s13 }
  0x43   : > { %v1175_v5 = vpack.c.bf16 %v406_v62, %v402_v61  ;;  %v408_v7 = vld [vmem:[%s2083_s3 + $0x188] sm:$0xff]  ;;  %v410_v9 = vld [vmem:[%s2083_s3 + $0x198] sm:$0xff]  ;;  %v1113_v11 = vpack.c.bf16 %v403_v3, %v399_v2  ;;  %v1177_v12 = vpack.c.bf16 %v405_v6, %v401_v4  ;;  %v407_v14 = vld [vmem:[%s2083_s3 + $0x180] sm:$0xff]  ;;  %s1692_s7 = sld [smem:[#allocation7 + %s329_s27]]  ;;  %s230_s28 = scalar_lea.vmem [#allocation3], %s1501_s13 }
  0x44   : > { %1106 = vmatpush1.bf16.msra.mxu0 %v1105_v51  ;;  %v412_v8 = vld [vmem:[%s2083_s3 + $0x1a8] sm:$0xff]  ;;  %v414_v10 = vld [vmem:[%s2083_s3 + $0x1b8] sm:$0xff]  ;;  %v411_v15 = vld [vmem:[%s2083_s3 + $0x1a0] sm:$0xff]  ;;  %s1703_s9 = sld [smem:[#allocation7 + %s337_s20]]  ;;  %s235_s30 = scalar_lea.vmem [#allocation2], %s1515_s23 }
  0x45   : > { %1170 = vmatpush1.bf16.msra.mxu1 %v1169_v52  ;;  %1108 = vmatprep.subr.bf16.mxu0 %v1107_v53  ;;  %v1115_v13 = vpack.c.bf16 %v412_v8, %v408_v7  ;;  %v409_v16 = vld [vmem:[%s2083_s3 + $0x190] sm:$0xff]  ;;  %v1179_v17 = vpack.c.bf16 %v414_v10, %v410_v9  ;;  %v416_v19 = vld [vmem:[%s2083_s3 + $0x1c8] sm:$0xff]  ;;  %v418_v21 = vld [vmem:[%s2083_s3 + $0x1d8] sm:$0xff]  ;;  %v1117_v23 = vpack.c.bf16 %v411_v15, %v407_v14  ;;  %s1714_s17 = sld [smem:[#allocation7 + %s345_s1]]  ;;  %s238_s21 = scalar_lea.vmem [#allocation3], %s1515_s23 }
  0x46   : > { %1172 = vmatprep.subr.bf16.mxu1 %v1171_v57  ;;  %v413_v18 = vld [vmem:[%s2083_s3 + $0x1b0] sm:$0xff]  ;;  %v420_v20 = vld [vmem:[%s2083_s3 + $0x1e8] sm:$0xff]  ;;  %v422_v22 = vld [vmem:[%s2083_s3 + $0x1f8] sm:$0xff]  ;;  %s243_s1 = scalar_lea.vmem [#allocation2], %s1529_s0  ;;  %s246_s16 = scalar_lea.vmem [#allocation3], %s1529_s0 }
  0x47   : > { %v1181_v24 = vpack.c.bf16 %v413_v18, %v409_v16  ;;  %v1119_v25 = vpack.c.bf16 %v420_v20, %v416_v19  ;;  %v415_v26 = vld [vmem:[%s2083_s3 + $0x1c0] sm:$0xff]  ;;  %v417_v28 = vld [vmem:[%s2083_s3 + $0x1d0] sm:$0xff]  ;;  %v1183_v29 = vpack.c.bf16 %v422_v22, %v418_v21  ;;  %v424_v31 = vld [vmem:[%s2083_s3 + $0x208] sm:$0xff]  ;;  %s254_s6 = scalar_lea.vmem [#allocation3], %s1533_s11  ;;  %s259_s20 = scalar_lea.vmem [#allocation2], %s1547_s26 }
  0x48   : > { %1110 = vmatpush1.bf16.msra.mxu0 %v1109_v63  ;;  %v419_v27 = vld [vmem:[%s2083_s3 + $0x1e0] sm:$0xff]  ;;  %v421_v30 = vld [vmem:[%s2083_s3 + $0x1f0] sm:$0xff]  ;;  %v428_v32 = vld [vmem:[%s2083_s3 + $0x228] sm:$0xff]  ;;  %s267_s13 = scalar_lea.vmem [#allocation2], %s1566_s22  ;;  %s270_s24 = scalar_lea.vmem [#allocation3], %s1566_s22 }
  0x49   : > { %1174 = vmatpush1.bf16.msra.mxu1 %v1173_v0  ;;  %1112 = vmatprep.subr.bf16.mxu0 %v1111_v1  ;;  %v426_v33 = vld [vmem:[%s2083_s3 + $0x218] sm:$0xff]  ;;  %v1121_v35 = vpack.c.bf16 %v419_v27, %v415_v26  ;;  %v1185_v36 = vpack.c.bf16 %v421_v30, %v417_v28  ;;  %v1123_v37 = vpack.c.bf16 %v428_v32, %v424_v31  ;;  %v423_v38 = vld [vmem:[%s2083_s3 + $0x200] sm:$0xff]  ;;  %v425_v40 = vld [vmem:[%s2083_s3 + $0x210] sm:$0xff]  ;;  %s275_s23 = scalar_lea.vmem [#allocation2], %s1613_s19  ;;  %s283_s22 = scalar_lea.vmem [#allocation2], %s1635_s8 }
  0x4a   : > { %1176 = vmatprep.subr.bf16.mxu1 %v1175_v5  ;;  %v430_v34 = vld [vmem:[%s2083_s3 + $0x238] sm:$0xff]  ;;  %v427_v39 = vld [vmem:[%s2083_s3 + $0x220] sm:$0xff]  ;;  %v429_v42 = vld [vmem:[%s2083_s3 + $0x230] sm:$0xff]  ;;  %s302_s27 = scalar_lea.vmem [#allocation3], %s1656_s14  ;;  %s331_s0 = scalar_lea.vmem [#allocation2], %s1692_s7 }
  0x4b   : > { %v1187_v41 = vpack.c.bf16 %v430_v34, %v426_v33  ;;  %v432_v43 = vld [vmem:[%s2083_s3 + $0x248] sm:$0xff]  ;;  %v434_v45 = vld [vmem:[%s2083_s3 + $0x258] sm:$0xff]  ;;  %v1125_v47 = vpack.c.bf16 %v427_v39, %v423_v38  ;;  %v1189_v48 = vpack.c.bf16 %v429_v42, %v425_v40  ;;  %v431_v50 = vld [vmem:[%s2083_s3 + $0x240] sm:$0xff]  ;;  %s334_s2 = scalar_lea.vmem [#allocation3], %s1692_s7 }
  0x4c   : > { %1114 = vmatpush1.bf16.msra.mxu0 %v1113_v11  ;;  %v436_v44 = vld [vmem:[%s2083_s3 + $0x268] sm:$0xff]  ;;  %v438_v46 = vld [vmem:[%s2083_s3 + $0x278] sm:$0xff]  ;;  %v435_v51 = vld [vmem:[%s2083_s3 + $0x260] sm:$0xff] }
  0x4d   : > { %1178 = vmatpush1.bf16.msra.mxu1 %v1177_v12  ;;  %1116 = vmatprep.subr.bf16.mxu0 %v1115_v13  ;;  %v1127_v49 = vpack.c.bf16 %v436_v44, %v432_v43  ;;  %v433_v52 = vld [vmem:[%s2083_s3 + $0x250] sm:$0xff]  ;;  %v1191_v53 = vpack.c.bf16 %v438_v46, %v434_v45  ;;  %v440_v55 = vld [vmem:[%s2083_s3 + $0x288] sm:$0xff]  ;;  %v442_v57 = vld [vmem:[%s2083_s3 + $0x298] sm:$0xff]  ;;  %v1129_v59 = vpack.c.bf16 %v435_v51, %v431_v50 }
  0x4e   : > { %1180 = vmatprep.subr.bf16.mxu1 %v1179_v17  ;;  %v437_v54 = vld [vmem:[%s2083_s3 + $0x270] sm:$0xff]  ;;  %v444_v56 = vld [vmem:[%s2083_s3 + $0x2a8] sm:$0xff]  ;;  %v446_v58 = vld [vmem:[%s2083_s3 + $0x2b8] sm:$0xff] }
  0x4f   : > { %v1193_v60 = vpack.c.bf16 %v437_v54, %v433_v52  ;;  %v1131_v61 = vpack.c.bf16 %v444_v56, %v440_v55  ;;  %v439_v62 = vld [vmem:[%s2083_s3 + $0x280] sm:$0xff]  ;;  %v441_v0 = vld [vmem:[%s2083_s3 + $0x290] sm:$0xff]  ;;  %v1195_v1 = vpack.c.bf16 %v446_v58, %v442_v57  ;;  %v448_v3 = vld [vmem:[%s2083_s3 + $0x2c8] sm:$0xff] }
  0x50   : > { %1118 = vmatpush1.bf16.msra.mxu0 %v1117_v23  ;;  %v443_v63 = vld [vmem:[%s2083_s3 + $0x2a0] sm:$0xff]  ;;  %v445_v2 = vld [vmem:[%s2083_s3 + $0x2b0] sm:$0xff]  ;;  %v452_v4 = vld [vmem:[%s2083_s3 + $0x2e8] sm:$0xff] }
  0x51   : > { %1182 = vmatpush1.bf16.msra.mxu1 %v1181_v24  ;;  %1120 = vmatprep.subr.bf16.mxu0 %v1119_v25  ;;  %v450_v5 = vld [vmem:[%s2083_s3 + $0x2d8] sm:$0xff]  ;;  %v1133_v7 = vpack.c.bf16 %v443_v63, %v439_v62  ;;  %v1749_v8 = vld [vmem:[%s2083_s3 + $0x2c0] sm:$0xff]  ;;  %v1759_v10 = vld [vmem:[%s2083_s3 + $0x2d0] sm:$0xff]  ;;  %v1197_v11 = vpack.c.bf16 %v445_v2, %v441_v0  ;;  %v1135_v12 = vpack.c.bf16 %v452_v4, %v448_v3 }
  0x52   : > { %1184 = vmatprep.subr.bf16.mxu1 %v1183_v29  ;;  %v454_v6 = vld [vmem:[%s2083_s3 + $0x2f8] sm:$0xff]  ;;  %v1754_v9 = vld [vmem:[%s2083_s3 + $0x2e0] sm:$0xff]  ;;  %v1764_v13 = vld [vmem:[%s2083_s3 + $0x2f0] sm:$0xff] }
  0x53   : > { %v1769_v14 = vld [vmem:[%s2083_s3 + $0x308] sm:$0xff]  ;;  %v1199_v16 = vpack.c.bf16 %v454_v6, %v450_v5  ;;  %v1779_v17 = vld [vmem:[%s2083_s3 + $0x318] sm:$0xff]  ;;  %v228_v19 = vld [vmem:[%s227_s18] sm:$0x1]  ;;  %v1137_v25 = vpack.c.bf16 %v1754_v9, %v1749_v8  ;;  %v1201_v33 = vpack.c.bf16 %v1764_v13, %v1759_v10  ;;  %s262_s18 = scalar_lea.vmem [#allocation3], %s1547_s26 }
  0x54   : > { %1122 = vmatpush1.bf16.msra.mxu0 %v1121_v35  ;;  %v1774_v15 = vld [vmem:[%s2083_s3 + $0x328] sm:$0xff]  ;;  %v1784_v18 = vld [vmem:[%s2083_s3 + $0x338] sm:$0xff]  ;;  %v1790_v20 = vld [vmem:[%s2083_s3 + $0x300] sm:$0xff]  ;;  %229 = vst [vmem:[#allocation4] sm:$0x1] %v228_v19 }
  0x55   : > { %1186 = vmatpush1.bf16.msra.mxu1 %v1185_v36  ;;  %1124 = vmatprep.subr.bf16.mxu0 %v1123_v37  ;;  %v1795_v21 = vld [vmem:[%s2083_s3 + $0x320] sm:$0xff]  ;;  %v1805_v26 = vld [vmem:[%s2083_s3 + $0x310] sm:$0xff]  ;;  %v1815_v28 = vld [vmem:[%s2083_s3 + $0x348] sm:$0xff]  ;;  %v1139_v34 = vpack.c.bf16 %v1774_v15, %v1769_v14  ;;  %v1203_v40 = vpack.c.bf16 %v1784_v18, %v1779_v17 }
  0x56   : > { %1188 = vmatprep.subr.bf16.mxu1 %v1187_v41  ;;  %v231_v22 = vld [vmem:[%s230_s28] sm:$0x1]  ;;  %v1810_v27 = vld [vmem:[%s2083_s3 + $0x330] sm:$0xff]  ;;  %v1820_v29 = vld [vmem:[%s2083_s3 + $0x368] sm:$0xff]  ;;  %s251_s28 = scalar_lea.vmem [#allocation2], %s1533_s11 }
  0x57   : > { %v236_v23 = vld [vmem:[%s235_s30] sm:$0x1]  ;;  %232 = vst [vmem:[#allocation5] sm:$0x1] %v231_v22  ;;  %v1832_v35 = vld [vmem:[%s2083_s3 + $0x358] sm:$0xff]  ;;  %v1865_v50 = vld [vmem:[%s2083_s3 + $0x350] sm:$0xff]  ;;  %v1205_v57 = vpack.c.bf16 %v1810_v27, %v1805_v26  ;;  %v1143_v58 = vpack.c.bf16 %v1820_v29, %v1815_v28 }
  0x58   : > { %1126 = vmatpush1.bf16.msra.mxu0 %v1125_v47  ;;  %v239_v24 = vld [vmem:[%s238_s21] sm:$0x1]  ;;  %237 = vst [vmem:[#allocation4 + $0x8] sm:$0x1] %v236_v23  ;;  %v1837_v36 = vld [vmem:[%s2083_s3 + $0x378] sm:$0xff]  ;;  %v1870_v51 = vld [vmem:[%s2083_s3 + $0x370] sm:$0xff] }
  0x59   : > { %1190 = vmatpush1.bf16.msra.mxu1 %v1189_v48  ;;  %1128 = vmatprep.subr.bf16.mxu0 %v1127_v49  ;;  %v244_v30 = vld [vmem:[%s243_s1] sm:$0x1]  ;;  %240 = vst [vmem:[#allocation5 + $0x8] sm:$0x1] %v239_v24  ;;  %v1141_v49 = vpack.c.bf16 %v1795_v21, %v1790_v20  ;;  %v1875_v52 = vld [vmem:[%s2083_s3 + $0x388] sm:$0xff]  ;;  %s307_s1 = scalar_lea.vmem [#allocation2], %s1658_s12  ;;  %v1207_v0 = vpack.c.bf16 %v1837_v36, %v1832_v35 }
  0x5a   : > { %1192 = vmatprep.subr.bf16.mxu1 %v1191_v53  ;;  %v247_v31 = vld [vmem:[%s246_s16] sm:$0x1]  ;;  %245 = vst [vmem:[#allocation4 + $0x1] sm:$0x1] %v244_v30  ;;  %s278_s16 = scalar_lea.vmem [#allocation3], %s1613_s19  ;;  %v1880_v53 = vld [vmem:[%s2083_s3 + $0x3a8] sm:$0xff] }
  0x5b   : > { %v252_v32 = vld [vmem:[%s251_s28] sm:$0x1]  ;;  %248 = vst [vmem:[#allocation5 + $0x1] sm:$0x1] %v247_v31  ;;  %s286_s28 = scalar_lea.vmem [#allocation3], %s1635_s8  ;;  %s323_s30 = scalar_lea.vmem [#allocation2], %s1689_s10  ;;  %v1147_v13 = vpack.c.bf16 %v1880_v53, %v1875_v52 }
  0x5c   : > { %1130 = vmatpush1.bf16.msra.mxu0 %v1129_v59  ;;  %253 = vst [vmem:[#allocation4 + $0x9] sm:$0x1] %v252_v32  ;;  %v255_v37 = vld [vmem:[%s254_s6] sm:$0x1]  ;;  %v1892_v59 = vld [vmem:[%s2083_s3 + $0x398] sm:$0xff]  ;;  %s326_s21 = scalar_lea.vmem [#allocation3], %s1689_s10 }
  0x5d   : > { %1194 = vmatpush1.bf16.msra.mxu1 %v1193_v60  ;;  %1132 = vmatprep.subr.bf16.mxu0 %v1131_v61  ;;  %v260_v38 = vld [vmem:[%s259_s20] sm:$0x1]  ;;  %256 = vst [vmem:[#allocation5 + $0x9] sm:$0x1] %v255_v37  ;;  %v1897_v60 = vld [vmem:[%s2083_s3 + $0x3b8] sm:$0xff]  ;;  %s342_s19 = scalar_lea.vmem [#allocation3], %s1703_s9 }
  0x5e   : > { %1196 = vmatprep.subr.bf16.mxu1 %v1195_v1  ;;  %v263_v39 = vld [vmem:[%s262_s18] sm:$0x1]  ;;  %261 = vst [vmem:[#allocation4 + $0x2] sm:$0x1] %v260_v38  ;;  %s291_s18 = scalar_lea.vmem [#allocation2], %s1654_s29  ;;  %s347_s6 = scalar_lea.vmem [#allocation2], %s1714_s17  ;;  %v1211_v17 = vpack.c.bf16 %v1897_v60, %v1892_v59 }
  0x5f   : > { %v268_v41 = vld [vmem:[%s267_s13] sm:$0x1]  ;;  %264 = vst [vmem:[#allocation5 + $0x2] sm:$0x1] %v263_v39  ;;  %s294_s13 = scalar_lea.vmem [#allocation3], %s1654_s29  ;;  %v473_v15 = vld [vmem:[%s2083_s3 + $0x390] sm:$0xff] }
  0x60   : > { %1134 = vmatpush1.bf16.msra.mxu0 %v1133_v7  ;;  %v271_v42 = vld [vmem:[%s270_s24] sm:$0x1]  ;;  %269 = vst [vmem:[#allocation4 + $0xa] sm:$0x1] %v268_v41  ;;  %s299_s24 = scalar_lea.vmem [#allocation2], %s1656_s14  ;;  %v477_v18 = vld [vmem:[%s2083_s3 + $0x3b0] sm:$0xff] }
  0x61   : > { %1198 = vmatpush1.bf16.msra.mxu1 %v1197_v11  ;;  %1136 = vmatprep.subr.bf16.mxu0 %v1135_v12  ;;  %v276_v43 = vld [vmem:[%s275_s23] sm:$0x1]  ;;  %272 = vst [vmem:[#allocation5 + $0xa] sm:$0x1] %v271_v42  ;;  %v1209_v12 = vpack.c.bf16 %v1870_v51, %v1865_v50  ;;  %v480_v19 = vld [vmem:[%s2083_s3 + $0x3c8] sm:$0xff]  ;;  %v482_v21 = vld [vmem:[%s2083_s3 + $0x3d8] sm:$0xff]  ;;  %v1213_v24 = vpack.c.bf16 %v477_v18, %v473_v15 }
  0x62   : > { %1200 = vmatprep.subr.bf16.mxu1 %v1199_v16  ;;  %v1850_v44 = vld [vmem:[%s2083_s3 + $0x340] sm:$0xff]  ;;  %277 = vst [vmem:[#allocation4 + $0x3] sm:$0x1] %v276_v43  ;;  %v484_v20 = vld [vmem:[%s2083_s3 + $0x3e8] sm:$0xff]  ;;  %v486_v22 = vld [vmem:[%s2083_s3 + $0x3f8] sm:$0xff]  ;;  %s2109_s8 = sld [smem:[#allocation12_spill]] }
  0x63   : > { %v1855_v45 = vld [vmem:[%s2083_s3 + $0x360] sm:$0xff]  ;;  %v1215_v28 = vpack.c.bf16 %v486_v22, %v482_v21  ;;  %v481_v29 = vld [vmem:[%s2083_s3 + $0x3d0] sm:$0xff]  ;;  %v665_v37 = vld [vmem:[%s2085_s5 + $0x8] sm:$0xff] }
  0x64   : > { %v279_v46 = vld [vmem:[%s278_s16] sm:$0x1]  ;;  %1138 = vmatpush1.bf16.msra.mxu0 %v1137_v25  ;;  %s310_s16 = scalar_lea.vmem [#allocation3], %s1658_s12  ;;  %v1145_v8 = vpack.c.bf16 %v1855_v45, %v1850_v44  ;;  %v1151_v25 = vpack.c.bf16 %v484_v20, %v480_v19  ;;  %v485_v30 = vld [vmem:[%s2083_s3 + $0x3f0] sm:$0xff]  ;;  %v667_v42 = vld [vmem:[%s2085_s5 + $0x18] sm:$0xff] }
  0x65   : > { %v284_v47 = vld [vmem:[%s283_s22] sm:$0x1]  ;;  %280 = vst [vmem:[#allocation5 + $0x3] sm:$0x1] %v279_v46  ;;  %1202 = vmatpush1.bf16.msra.mxu1 %v1201_v33  ;;  %1140 = vmatprep.subr.bf16.mxu0 %v1139_v34  ;;  %s315_s22 = scalar_lea.vmem [#allocation2], %s1670_s25  ;;  %v1217_v34 = vpack.c.bf16 %v485_v30, %v481_v29  ;;  %v666_v41 = vld [vmem:[%s2085_s5 + $0x10] sm:$0xff] }
  0x66   : > { %v287_v48 = vld [vmem:[%s286_s28] sm:$0x1]  ;;  %285 = vst [vmem:[#allocation4 + $0xb] sm:$0x1] %v284_v47  ;;  %1204 = vmatprep.subr.bf16.mxu1 %v1203_v40  ;;  %s318_s28 = scalar_lea.vmem [#allocation3], %s1670_s25  ;;  %s339_s25 = scalar_lea.vmem [#allocation2], %s1703_s9  ;;  %v1223_v43 = vpack.c.bf16 %v667_v42, %v666_v41 }
  0x67   : > { %v292_v54 = vld [vmem:[%s291_s18] sm:$0x1]  ;;  %288 = vst [vmem:[#allocation5 + $0xb] sm:$0x1] %v287_v48  ;;  %s350_s9 = scalar_lea.vmem [#allocation3], %s1714_s17  ;;  %v1338_v40 = vmov 0.0|0.0  }
  0x68   : > { %v295_v55 = vld [vmem:[%s294_s13] sm:$0x1]  ;;  %293 = vst [vmem:[#allocation4 + $0x4] sm:$0x1] %v292_v54  ;;  %1142 = vmatpush1.bf16.msra.mxu0 %v1141_v49  ;;  %v669_v45 = vld [vmem:[%s2085_s5 + $0x28] sm:$0xff]  ;;  %v1340_v46 = vmov 0.0  }
  0x69   : > { %v300_v56 = vld [vmem:[%s299_s24] sm:$0x1]  ;;  %296 = vst [vmem:[#allocation5 + $0x4] sm:$0x1] %v295_v55  ;;  %1206 = vmatpush1.bf16.msra.mxu1 %v1205_v57  ;;  %1144 = vmatprep.subr.bf16.mxu0 %v1143_v58  ;;  %v670_v48 = vld [vmem:[%s2085_s5 + $0x30] sm:$0xff]  ;;  %v671_v49 = vld [vmem:[%s2085_s5 + $0x38] sm:$0xff] }
  0x6a   : > { %301 = vst [vmem:[#allocation4 + $0xc] sm:$0x1] %v300_v56  ;;  %v303_v61 = vld [vmem:[%s302_s27] sm:$0x1]  ;;  %1208 = vmatprep.subr.bf16.mxu1 %v1207_v0  ;;  %v1229_v50 = vpack.c.bf16 %v671_v49, %v670_v48  ;;  %v673_v52 = vld [vmem:[%s2085_s5 + $0x48] sm:$0xff]  ;;  %v674_v54 = vld [vmem:[%s2085_s5 + $0x50] sm:$0xff] }
  0x6b   : > { %v308_v62 = vld [vmem:[%s307_s1] sm:$0x1]  ;;  %304 = vst [vmem:[#allocation5 + $0xc] sm:$0x1] %v303_v61  ;;  %v675_v55 = vld [vmem:[%s2085_s5 + $0x58] sm:$0xff]  ;;  %v677_v58 = vld [vmem:[%s2085_s5 + $0x68] sm:$0xff] }
  0x6c   : > { %v311_v63 = vld [vmem:[%s310_s16] sm:$0x1]  ;;  %309 = vst [vmem:[#allocation4 + $0x5] sm:$0x1] %v308_v62  ;;  %1146 = vmatpush1.bf16.msra.mxu0 %v1145_v8  ;;  %v1235_v56 = vpack.c.bf16 %v675_v55, %v674_v54  ;;  %v678_v60 = vld [vmem:[%s2085_s5 + $0x70] sm:$0xff]  ;;  %v679_v61 = vld [vmem:[%s2085_s5 + $0x78] sm:$0xff] }
  0x6d   : > { %v316_v1 = vld [vmem:[%s315_s22] sm:$0x1]  ;;  %312 = vst [vmem:[#allocation5 + $0x5] sm:$0x1] %v311_v63  ;;  %1210 = vmatpush1.bf16.msra.mxu1 %v1209_v12  ;;  %1148 = vmatprep.subr.bf16.mxu0 %v1147_v13  ;;  %v1241_v62 = vpack.c.bf16 %v679_v61, %v678_v60  ;;  %v489_v63 = vlaneseq  ;;  %s2019_s20 = sld [smem:[#allocation8 + %s2109_s8]]  ;;  %s2111_s18 = sadd.s32 2, %s2109_s8 }
  0x6e   : > { %v319_v2 = vld [vmem:[%s318_s28] sm:$0x1]  ;;  %317 = vst [vmem:[#allocation4 + $0xd] sm:$0x1] %v316_v1  ;;  %1212 = vmatprep.subr.bf16.mxu1 %v1211_v17  ;;  %s2027_s13 = sld [smem:[#allocation8 + %s2111_s18]]  ;;  %s2112_s24 = sadd.s32 3, %s2109_s8 }
  0x6f   : > { %v324_v3 = vld [vmem:[%s323_s30] sm:$0x1]  ;;  %320 = vst [vmem:[#allocation5 + $0xd] sm:$0x1] %v319_v2  ;;  %v490_v0 = vshrl.u32 %v489_v63, 7  ;;  %s2031_s23 = sld [smem:[#allocation8 + %s2112_s24]] }
  0x70   : > { %v471_v4 = vld [vmem:[%s2083_s3 + $0x380] sm:$0xff]  ;;  %325 = vst [vmem:[#allocation4 + $0x6] sm:$0x1] %v324_v3  ;;  %s2113_s11 = sadd.s32 4, %s2109_s8  ;;  %s2114_s17 = sadd.s32 5, %s2109_s8 }
  0x71   : > { %v327_v5 = vld [vmem:[%s326_s21] sm:$0x1]  ;;  %1214 = vmatpush1.bf16.msra.mxu1 %v1213_v24  ;;  %v491_v1 = vsub.s32 0, %v490_v0  ;;  %v503_v15 = vsub.s32 3, %v490_v0  ;;  %v495_v22 = vsub.s32 1, %v490_v0  ;;  %s2035_s29 = sld [smem:[#allocation8 + %s2113_s11]] }
  0x72   : > { %v332_v6 = vld [vmem:[%s331_s0] sm:$0x1]  ;;  %328 = vst [vmem:[#allocation5 + $0x6] sm:$0x1] %v327_v5  ;;  %1216 = vmatprep.subr.bf16.mxu1 %v1215_v28  ;;  %s2039_s26 = sld [smem:[#allocation8 + %s2114_s17]]  ;;  %s2115_s27 = sadd.s32 6, %s2109_s8 }
  0x73   : > { %v335_v7 = vld [vmem:[%s334_s2] sm:$0x1]  ;;  %333 = vst [vmem:[#allocation4 + $0xe] sm:$0x1] %v332_v6  ;;  %s2043_s1 = sld [smem:[#allocation8 + %s2115_s27]]  ;;  %s2116_s16 = sadd.s32 7, %s2109_s8 }
  0x74   : > { %v340_v9 = vld [vmem:[%s339_s25] sm:$0x1]  ;;  %336 = vst [vmem:[#allocation5 + $0xe] sm:$0x1] %v335_v7  ;;  %s2047_s22 = sld [smem:[#allocation8 + %s2116_s16]]  ;;  %s840_s28 = scalar_lea.vmem [#allocation2], %s2019_s20 }
  0x75   : > { %v343_v10 = vld [vmem:[%s342_s19] sm:$0x1]  ;;  %341 = vst [vmem:[#allocation4 + $0x7] sm:$0x1] %v340_v9  ;;  %1218 = vmatpush1.bf16.msra.mxu1 %v1217_v34  ;;  %s850_s14 = scalar_lea.vmem [#allocation2], %s2027_s13  ;;  %s855_s12 = scalar_lea.vmem [#allocation2], %s2031_s23 }
  0x76   : > { %v348_v11 = vld [vmem:[%s347_s6] sm:$0x1]  ;;  %344 = vst [vmem:[#allocation5 + $0x7] sm:$0x1] %v343_v10  ;;  %1243 = vmatprep.subr.bf16.mxu1 %v1338_v40  ;;  %v499_v10 = vsub.s32 2, %v490_v0  ;;  %s842_s19 = scalar_lea.vmem [#allocation3], %s2019_s20 }
  0x77   : > { %v475_v14 = vld [vmem:[%s2083_s3 + $0x3a0] sm:$0xff]  ;;  %349 = vst [vmem:[#allocation4 + $0xf] sm:$0x1] %v348_v11  ;;  %s860_s21 = scalar_lea.vmem [#allocation2], %s2035_s29  ;;  %s852_s10 = scalar_lea.vmem [#allocation3], %s2027_s13 }
  0x78   : > { %v351_v16 = vld [vmem:[%s350_s9] sm:$0x1]  ;;  %v1149_v23 = vpack.c.bf16 %v475_v14, %v471_v4  ;;  %s865_s0 = scalar_lea.vmem [#allocation2], %s2039_s26  ;;  %s857_s7 = scalar_lea.vmem [#allocation3], %s2031_s23 }
  0x79   : > { %352 = vst [vmem:[#allocation5 + $0xf] sm:$0x1] %v351_v16  ;;  %v479_v26 = vld [vmem:[%s2083_s3 + $0x3c0] sm:$0xff]  ;;  %s870_s2 = scalar_lea.vmem [#allocation2], %s2043_s1  ;;  %s872_s18 = scalar_lea.vmem [#allocation3], %s2043_s1 }
  0x7a   : > { %v483_v27 = vld [vmem:[%s2083_s3 + $0x3e0] sm:$0xff]  ;;  %1150 = vmatpush1.bf16.msra.mxu0 %v1149_v23  ;;  %s875_s25 = scalar_lea.vmem [#allocation2], %s2047_s22  ;;  %s877_s24 = scalar_lea.vmem [#allocation3], %s2047_s22 }
  0x7b   : > { %v1153_v31 = vpack.c.bf16 %v483_v27, %v479_v26  ;;  %1152 = vmatprep.subr.bf16.mxu0 %v1151_v25  ;;  %v664_v36 = vld [vmem:[%s2085_s5] sm:$0xff]  ;;  %s2117_s11 = sld [smem:[#allocation11_spill]] }
  0x7c   : > { %v1958_v32 = vld [vmem:[#allocation4] sm:$0xff]  ;;  %v1220_v39 = vpack.c.bf16 %v665_v37, %v664_v36 }
  0x7d   : > { %v353_v38 = vld [vmem:[%s1402_s15] sm:$0xff]  ;;  %s2110_s15 = sadd.s32 1, %s2109_s8  ;;  %v356_v37 = vld [vmem:[#allocation5] sm:$0xff]  ;;  %s862_s8 = scalar_lea.vmem [#allocation3], %s2035_s29 }
  0x7e   : > { %v1960_v33 = vld [vmem:[#allocation4 + $0x8] sm:$0xff]  ;;  %1154 = vmatpush1.bf16.msra.mxu0 %v1153_v31  ;;  %v668_v44 = vld [vmem:[%s2085_s5 + $0x20] sm:$0xff]  ;;  %s2023_s9 = sld [smem:[#allocation8 + %s2110_s15]]  ;;  %s867_s15 = scalar_lea.vmem [#allocation3], %s2039_s26 }
  0x7f   : > { %v358_v35 = vadd.f32 %v1960_v33, %v1958_v32  ;;  %1219 = vmatprep.subr.bf16.mxu0 %v1338_v40  ;;  %v1226_v47 = vpack.c.bf16 %v669_v45, %v668_v44  ;;  %v672_v51 = vld [vmem:[%s2085_s5 + $0x40] sm:$0xff] }
  0x80   : > { %v1232_v53 = vpack.c.bf16 %v673_v52, %v672_v51  ;;  %v676_v57 = vld [vmem:[%s2085_s5 + $0x60] sm:$0xff] }
  0x81   : > { %573 = vmatprep.mubr.f32.mxu0 %v358_v35  ;;  %644 = vmatprep.mubr.f32.mxu1 %v358_v35  ;;  %v1238_v59 = vpack.c.bf16 %v677_v58, %v676_v57  ;;  %v487_v2 = vld [vmem:[%s2084_s4] sm:$0xf]  ;;  %p984_p1 = scmp.ne.s32.totalorder %s2117_s11, 2 }
  0x82   : > { %574 = vmatmul.mubr.f32.vlgmr.msra.gmra.mrb[0].mxu0 %v353_v38  ;;  %645 = vmatmul.mubr.f32.vlgmr.msra.gmra.mrb[0].mxu1 %v353_v38  ;;  %v492_v3 = vrot.slane %v487_v2, %v491_v1  ;;  %v500_v11 = vrot.slane %v487_v2, %v499_v10  ;;  %v504_v17 = vrot.slane %v487_v2, %v503_v15  ;;  %s2118_s13 = sld [smem:[#allocation14_spill]] (!%p984_p1)  ;;  %s2119_s27 = sld [smem:[#allocation15_spill]] (!%p984_p1) }
  0x83   : > { %1221 = vmatpush3.bf16.msra.mxu0 %v1220_v39  ;;  %1245 = vmatpush3.bf16.msra.mxu1 %v1220_v39  ;;  %v496_v30 = vrot.slane %v487_v2, %v495_v22  ;;  %v357_v39 = vld [vmem:[#allocation5 + $0x8] sm:$0xff] }
  0x84   : > { %1222 = vmatprep.subr.bf16.mxu0 %v1338_v40  ;;  %1246 = vmatprep.subr.bf16.mxu1 %v1338_v40  ;;  %s845_s30 = scalar_lea.vmem [#allocation2], %s2023_s9  ;;  %s847_s6 = scalar_lea.vmem [#allocation3], %s2023_s9 }
  0x85   : > { %1053 = vmatprep.mubr.msk.f32.mxu0 %vm1339_vm0, %v1340_v46  ;;  %1088 = vmatprep.mubr.msk.f32.mxu1 %vm1339_vm0, %v1340_v46 }
  0x87   : > { %1224 = vmatpush3.bf16.msra.mxu0 %v1223_v43  ;;  %1248 = vmatpush3.bf16.msra.mxu1 %v1223_v43 }
  0x88   : > { %1225 = vmatprep.subr.bf16.mxu0 %v1338_v40  ;;  %1249 = vmatprep.subr.bf16.mxu1 %v1338_v40 }
  0x8b   : > { %1227 = vmatpush3.bf16.msra.mxu0 %v1226_v47  ;;  %1251 = vmatpush3.bf16.msra.mxu1 %v1226_v47 }
  0x8c   : > { %1228 = vmatprep.subr.bf16.mxu0 %v1338_v40  ;;  %1252 = vmatprep.subr.bf16.mxu1 %v1338_v40 }
  0x8f   : > { %1230 = vmatpush3.bf16.msra.mxu0 %v1229_v50  ;;  %1254 = vmatpush3.bf16.msra.mxu1 %v1229_v50 }
  0x90   : > { %1231 = vmatprep.subr.bf16.mxu0 %v1338_v40  ;;  %1255 = vmatprep.subr.bf16.mxu1 %v1338_v40 }
  0x93   : > { %1233 = vmatpush3.bf16.msra.mxu0 %v1232_v53  ;;  %1257 = vmatpush3.bf16.msra.mxu1 %v1232_v53 }
  0x94   : > { %1234 = vmatprep.subr.bf16.mxu0 %v1338_v40  ;;  %1258 = vmatprep.subr.bf16.mxu1 %v1338_v40 }
  0x97   : > { %1236 = vmatpush3.bf16.msra.mxu0 %v1235_v56  ;;  %1260 = vmatpush3.bf16.msra.mxu1 %v1235_v56 }
  0x98   : > { %1237 = vmatprep.subr.bf16.mxu0 %v1338_v40  ;;  %1261 = vmatprep.subr.bf16.mxu1 %v1338_v40 }
  0x9b   : > { %1239 = vmatpush3.bf16.msra.mxu0 %v1238_v59  ;;  %1263 = vmatpush3.bf16.msra.mxu1 %v1238_v59 }
  0x9c   : > { %1240 = vmatprep.subr.bf16.mxu0 %v1338_v40  ;;  %1264 = vmatprep.subr.bf16.mxu1 %v1338_v40 }
  0x9f   : > { %1242 = vmatpush3.bf16.msra.mxu0 %v1241_v62  ;;  %1266 = vmatpush3.bf16.msra.mxu1 %v1241_v62 }
  0xa2   : > { %1054 = vmatmul.mubr.f32.vlgmr.msra.gmra.mrb[2].mxu0 %v1958_v32  ;;  %1089 = vmatmul.mubr.f32.vlgmr.msra.gmra.mrb[2].mxu1 %v1960_v33 }
 0x155   : > { %v575_v4 = vpop.f32.mrb[0].mxu0  ;;  %v646_v6 = vpop.f32.mrb[0].mxu1 }
 0x156   : > { %v576_v5 = vadd.f32 %v575_v4, %v492_v3  ;;  %v577_v7 = vpop.f32.mrb[1].mxu0  ;;  %v648_v8 = vpop.f32.mrb[1].mxu1  ;;  %v647_v12 = vadd.f32 %v646_v6, %v500_v11 }
 0x157   : > { %v649_v20 = vadd.f32 %v648_v8, %v504_v17  ;;  %v578_v31 = vadd.f32 %v577_v7, %v496_v30 }
 0x158   : > { %v980_v9 = vmul.f32 -1.442695, %v576_v5 }
 0x159   : > { %v981_v32 = vmul.f32 -1.442695, %v578_v31 }
 0x15a   : > { %1281 = vpow2.f32 %v980_v9 }
 0x15b   : > { %1283 = vtanh.f32 %v647_v12 }
 0x164   : > { %v1282_v13 = vpop.eup %1281 }
 0x165   : > { %v654_v14 = vadd.f32 1.0, %v1282_v13  ;;  %v1284_v16 = vpop.eup %1283 }
 0x167   : > { %1285 = vrcp.f32 %v654_v14 }
 0x171   : > { %v1286_v18 = vpop.eup %1285 }
 0x172   : > { %v835_v19 = vmul.f32 %v1286_v18, %v1284_v16 }
 0x175   : > { %v746_v21 = vpop.f32.mrb[2].mxu0  ;;  %v823_v24 = vpop.f32.mrb[2].mxu1 }
 0x176   : > { %v747_v23 = vadd.f32 %v746_v21, %v649_v20  ;;  %v1055_v25 = vpop.f32.mrb[3].mxu0  ;;  %v824_v26 = vadd.f32 %v823_v24, %v649_v20  ;;  %v1090_v27 = vpop.f32.mrb[3].mxu1 }
 0x178   : > { %v982_v28 = vmul.f32 -1.442695, %v747_v23  ;;  %v983_v29 = vmul.f32 -1.442695, %v824_v26 }
 0x17a   : > { %1287 = vpow2.f32 %v982_v28 }
 0x17b   : > { %1289 = vpow2.f32 %v983_v29 }
 0x17c   : > { %1291 = vpow2.f32 %v981_v32 }
 0x184   : > { %v1288_v33 = vpop.eup %1287 }
 0x185   : > { %v1290_v34 = vpop.eup %1289  ;;  %v753_v35 = vadd.f32 1.0, %v1288_v33 }
 0x186   : > { %v830_v36 = vadd.f32 1.0, %v1290_v34  ;;  %v1292_v38 = vpop.eup %1291 }
 0x187   : > { %1293 = vrcp.f32 %v753_v35  ;;  %v660_v44 = vadd.f32 1.0, %v1292_v38 }
 0x188   : > { %1295 = vrcp.f32 %v830_v36 }
 0x189   : > { %1297 = vrcp.f32 %v660_v44 }
 0x191   : > { %v1294_v40 = vpop.eup %1293 }
 0x192   : > { %v1296_v41 = vpop.eup %1295  ;;  %v756_v42 = vmul.f32 %v1294_v40, %v356_v37 }
 0x193   : > { %v833_v43 = vmul.f32 %v1296_v41, %v357_v39  ;;  %v1298_v47 = vpop.eup %1297 }
 0x195   : > { %v834_v45 = vadd.f32 %v833_v43, %v756_v42 }
 0x197   : > { %v836_v46 = vadd.f32 %v835_v19, %v834_v45 }
 0x199   : > { %1299 = vtanh.f32 %v836_v46  ;;  %841 = vst [vmem:[%s840_s28] sm:$0x1] %v836_v46 }
 0x19a   : > { %846 = vst [vmem:[%s845_s30 - $0x1] sm:$0x2] %v836_v46 }
 0x19b   : > { %851 = vst [vmem:[%s850_s14 - $0x2] sm:$0x4] %v836_v46 }
 0x19c   : > { %856 = vst [vmem:[%s855_s12 - $0x3] sm:$0x8] %v836_v46 }
 0x19d   : > { %861 = vst [vmem:[%s860_s21 - $0x4] sm:$0x10] %v836_v46 }
 0x19e   : > { %866 = vst [vmem:[%s865_s0 - $0x5] sm:$0x20] %v836_v46 }
 0x19f   : > { %871 = vst [vmem:[%s870_s2 - $0x6] sm:$0x40] %v836_v46 }
 0x1a0   : > { %876 = vst [vmem:[%s875_s25 - $0x7] sm:$0x80] %v836_v46 }
 0x1a3   : > { %v1300_v48 = vpop.eup %1299 }
 0x1a4   : > { %v838_v49 = vmul.f32 %v1300_v48, %v1298_v47 }
 0x1a6   : > { %843 = vst [vmem:[%s842_s19] sm:$0x1] %v838_v49 }
 0x1a7   : > { %848 = vst [vmem:[%s847_s6 - $0x1] sm:$0x2] %v838_v49  ;;  %882 = sbr.rel (%p984_p1) target bundleno = 438 (0x1b6), region = 44  ;;  %v883_v50 = vld [vmem:[#allocation2] sm:$0xff] (!%p984_p1)  ;;  %v884_v51 = vld [vmem:[#allocation2 + $0x8] sm:$0xff] (!%p984_p1) }
 0x1a8   : > { %853 = vst [vmem:[%s852_s10 - $0x2] sm:$0x4] %v838_v49  ;;  %885 = vst [vmem:[%s2118_s13] sm:$0xff] (!%p984_p1), %v883_v50 }
 0x1a9   : > { %858 = vst [vmem:[%s857_s7 - $0x3] sm:$0x8] %v838_v49  ;;  %886 = vst [vmem:[%s2118_s13 + $0x8] sm:$0xff] (!%p984_p1), %v884_v51 }
 0x1aa   : > { %863 = vst [vmem:[%s862_s8 - $0x4] sm:$0x10] %v838_v49 }
 0x1ab   : > { %868 = vst [vmem:[%s867_s15 - $0x5] sm:$0x20] %v838_v49 }
 0x1ac   : > { %873 = vst [vmem:[%s872_s18 - $0x6] sm:$0x40] %v838_v49 }
 0x1ad   : > { %878 = vst [vmem:[%s877_s24 - $0x7] sm:$0x80] %v838_v49 }
 0x1b4   : > { %v887_v52 = vld [vmem:[#allocation3] sm:$0xff]  ;;  %v888_v53 = vld [vmem:[#allocation3 + $0x8] sm:$0xff] }
 0x1b5   : > { %889 = vst [vmem:[%s2119_s27] sm:$0xff] %v887_v52  ;;  %890 = vst [vmem:[%s2119_s27 + $0x8] sm:$0xff] %v888_v53 }
 0x1b6 PF: > { %s2120_s22 = sld [smem:[#allocation10_spill]] }
 0x1bc   : > { %s28_s1 = sadd.s32 1, %s2120_s22  }
 0x1bd   : > { %p25_p2 = scmp.ge.s32.totalorder %s28_s1, 5  }
 0x1bf   :  { %27 = sbr.rel (!%p25_p2) target bundleno = 28 (0x1c), region = 126 }

</bundles_post_ra>
